<compile_context>
chip_gen: v7x
topology: tpu7x:2x2x1
jax: 0.10.0
libtpu: 0.0.40
codegen_flags: <defaults>
</compile_context>

<pallas_src>
import jax
import jax.numpy as jnp
from jax import lax
from jax.experimental import pallas as pl
from jax.experimental.pallas import tpu as pltpu

B, L, D, V, K = 2, 32, 32, 16, 3   # batch, seq, hidden, vocab, short-conv taps
EPS = 1e-5


def _layernorm(h, g, b):
    """Single-pass LN: var = E[x^2] - E[x]^2 (two independent reductions)."""
    mean = jnp.mean(h, axis=-1, keepdims=True)
    msq = jnp.mean(h * h, axis=-1, keepdims=True)
    var = msq - mean * mean
    return (h - mean) * lax.rsqrt(var + EPS) * g + b


def _causal_dw_conv(u, w_ref, n_taps, n_acc=1):
    """Depthwise causal conv: y[l,c] = sum_t w[t,c] * u[l-t,c] (zero pad).

    The shifted operand is kept register-resident: pad = [u ; zeros] (2L rows)
    and each tap is a static sublane rotation (pltpu.roll) of `pad` followed
    by an aligned row-slice.  Taps are spread over `n_acc` independent partial
    accumulators to break the serial FMA dependence chain.
    """
    L_, _ = u.shape
    pad = jnp.concatenate([u, jnp.zeros_like(u)], axis=0)     # (2L, C), in vregs
    accs = [u * w_ref[0:1, :]] + [jnp.zeros_like(u) for _ in range(n_acc - 1)]
    for t in range(1, n_taps):
        # roll(pad, t)[l] = pad[(l - t) mod 2L]: rows [0:L) give u[l-t] for
        # l >= t and land in the zero half for l < t  -> causal shift.
        shifted = pltpu.roll(pad, shift=t, axis=0)[:L_, :]
        accs[t % n_acc] = accs[t % n_acc] + shifted * w_ref[t:t + 1, :]
    y = accs[0]
    for a in accs[1:]:
        y = y + a
    return y


def kernel(x_ref, win_ref, shortw_ref, longf_ref, wout_ref, whead_ref,
           small_ref, o_ref):
    # Packed small params: one (8, 128) tile (single DMA for 7 tiny vectors).
    ln1_g = small_ref[0:1, 0:D]
    ln1_b = small_ref[1:2, 0:D]
    b_out = small_ref[2:3, 0:D]
    ln2_g = small_ref[3:4, 0:D]
    ln2_b = small_ref[4:5, 0:D]
    b_head = small_ref[5:6, 0:V]
    b_in = small_ref[6:7, 0:3 * D]

    x = x_ref[...]                                           # (B*L, D)

    # pre-norm
    h = _layernorm(x, ln1_g, ln1_b)

    # fused in-projection x1|x2|v: one (B*L, D) x (D, 3D) matmul.
    z = jnp.dot(h, win_ref[...], preferred_element_type=jnp.float32) + b_in

    # Short conv (K=3 taps) per sample; row slices are sublane-aligned (free).
    u_parts, x2_parts = [], []
    for b in range(B):
        zb = z[b * L:(b + 1) * L, :]                         # (L, 3D)
        zc = _causal_dw_conv(zb, shortw_ref, K)              # fused short conv
        x1 = zc[:, 0:D]
        x2 = zc[:, D:2 * D]
        v = zc[:, 2 * D:3 * D]
        u_parts.append(x1 * v)
        x2_parts.append(x2)

    # Lane-batch both samples and run the 32-tap long conv ONCE over (L, B*D).
    # Shifts act on the L (sublane) axis only; samples sit in disjoint lane
    # slabs, so no causal leakage across the batch.
    u_lanes = jnp.concatenate(u_parts, axis=1)               # (L, B*D)
    g_lanes = _causal_dw_conv(u_lanes, longf_ref, L, n_acc=4)

    # Gate per sample and restack along rows (sublane concat is free).
    y = jnp.concatenate(
        [x2_parts[b] * g_lanes[:, b * D:(b + 1) * D] for b in range(B)],
        axis=0)                                              # (B*L, D)

    # output projection + residual
    out = jnp.dot(y, wout_ref[...], preferred_element_type=jnp.float32) + b_out
    res = x + out

    # final norm + LM head at native V width (no logits padding).
    h2 = _layernorm(res, ln2_g, ln2_b)
    logits = jnp.dot(h2, whead_ref[...],
                     preferred_element_type=jnp.float32) + b_head
    o_ref[...] = logits.astype(o_ref.dtype)


def hyena_glt_forward(x_emb, fp):
    """Single-step pallas_call over the whole (B*L)-row batch (nb = B)."""
    x2d = x_emb.reshape(B * L, D)
    out = pl.pallas_call(
        kernel,
        out_shape=jax.ShapeDtypeStruct((B * L, V), jnp.float32),
        grid_spec=pltpu.PrefetchScalarGridSpec(
            num_scalar_prefetch=0,
            grid=(1,),
            in_specs=[
                pl.BlockSpec((B * L, D), lambda g: (0, 0)),    # x (2-D slab)
                pl.BlockSpec((D, 3 * D), lambda g: (0, 0)),    # fused in-proj
                pl.BlockSpec((K, 3 * D), lambda g: (0, 0)),    # fused short taps
                pl.BlockSpec((L, B * D), lambda g: (0, 0)),    # lane-tiled long filter
                pl.BlockSpec((D, D), lambda g: (0, 0)),        # out-proj
                pl.BlockSpec((D, V), lambda g: (0, 0)),        # LM head (native V)
                pl.BlockSpec((8, 128), lambda g: (0, 0)),      # packed small params
            ],
            out_specs=pl.BlockSpec((B * L, V), lambda g: (0, 0)),
        ),
        compiler_params=pltpu.CompilerParams(
            dimension_semantics=("arbitrary",)),
    )(x2d, fp["w_in_cat"], fp["short_w_cat"], fp["long_filt_lanes"],
      fp["w_out"], fp["w_head"], fp["small"])
    return out.reshape(B, L, V)


# ----------------------- parameter packing (one-time) -----------------------
def pack_params(p):
    w_in_cat = jnp.concatenate([p["w_in"][0], p["w_in"][1], p["w_in"][2]],
                               axis=1)                               # (D, 3D)
    b_in_cat = jnp.concatenate([p["b_in"][0], p["b_in"][1], p["b_in"][2]],
                               axis=1)                               # (1, 3D)
    short_w_cat = jnp.concatenate(
        [p["short_w"][0], p["short_w"][1], p["short_w"][2]], axis=1)  # (K, 3D)
    long_filt_lanes = jnp.tile(p["long_filt"], (1, B))               # (L, B*D)

    small = jnp.zeros((8, 128), jnp.float32)
    small = small.at[0, :D].set(p["ln1_g"][0])
    small = small.at[1, :D].set(p["ln1_b"][0])
    small = small.at[2, :D].set(p["b_out"][0])
    small = small.at[3, :D].set(p["ln2_g"][0])
    small = small.at[4, :D].set(p["ln2_b"][0])
    small = small.at[5, :V].set(p["b_head"][0])
    small = small.at[6, :3 * D].set(b_in_cat[0])

    return {
        "w_in_cat": w_in_cat,
        "short_w_cat": short_w_cat,
        "long_filt_lanes": long_filt_lanes,
        "w_out": p["w_out"],
        "w_head": p["w_head"],
        "small": small,
    }


# -------------------- pure-JAX reference (for correctness) --------------------
def reference_forward(x_emb, p):
    def ln(h, g, b):
        mu = h.mean(-1, keepdims=True)
        var = ((h - mu) ** 2).mean(-1, keepdims=True)
        return (h - mu) * lax.rsqrt(var + EPS) * g + b

    def causal_dw(u, w):                     # u (L, C), w (T, C)
        T = w.shape[0]
        y = u * w[0:1, :]
        for t in range(1, T):
            shifted = jnp.concatenate(
                [jnp.zeros((t, u.shape[1]), u.dtype), u[:-t]], axis=0)
            y = y + shifted * w[t:t + 1, :]
        return y

    def single(x):                           # (L, D)
        h = ln(x, p["ln1_g"], p["ln1_b"])
        x1 = causal_dw(h @ p["w_in"][0] + p["b_in"][0], p["short_w"][0])
        x2 = causal_dw(h @ p["w_in"][1] + p["b_in"][1], p["short_w"][1])
        v = causal_dw(h @ p["w_in"][2] + p["b_in"][2], p["short_w"][2])
        y = x2 * causal_dw(x1 * v, p["long_filt"])
        res = x + (y @ p["w_out"] + p["b_out"])
        h2 = ln(res, p["ln2_g"], p["ln2_b"])
        return h2 @ p["w_head"] + p["b_head"]

    return jax.vmap(single)(x_emb)


# ------------------------------- params -------------------------------
def init_params(key):
    ks = jax.random.split(key, 8)

    def sc(k, shape, fan):
        return jax.random.normal(k, shape, jnp.float32) / jnp.sqrt(float(fan))

    decay = jnp.exp(-0.3 * jnp.arange(L, dtype=jnp.float32))[:, None]
    return {
        "embed": jax.random.normal(ks[0], (V, D), jnp.float32) * 0.02,
        "ln1_g": jnp.ones((1, D), jnp.float32),
        "ln1_b": jnp.zeros((1, D), jnp.float32),
        "w_in": sc(ks[1], (3, D, D), D),
        "b_in": jnp.zeros((3, 1, D), jnp.float32),
        "short_w": sc(ks[2], (3, K, D), K),
        "long_filt": sc(ks[3], (L, D), L) * decay,   # decaying implicit filter
        "w_out": sc(ks[4], (D, D), D),
        "b_out": jnp.zeros((1, D), jnp.float32),
        "ln2_g": jnp.ones((1, D), jnp.float32),
        "ln2_b": jnp.zeros((1, D), jnp.float32),
        "w_head": sc(ks[5], (D, V), D),
        "b_head": jnp.zeros((1, V), jnp.float32),
    }


if __name__ == "__main__":
    key = jax.random.PRNGKey(0)
    pkey, tkey = jax.random.split(key)
    params = init_params(pkey)
    fused = pack_params(params)

    tokens = jax.random.randint(tkey, (B, L), 0, V)          # (B, L) token ids
    x_emb = jnp.take(params["embed"], tokens, axis=0)        # (B, L, D) embeddings (glue)

    logits = hyena_glt_forward(x_emb, fused)
    logits = jax.block_until_ready(logits)

    ref = reference_forward(x_emb, params)
    assert logits.shape == (B, L, V)
    err = float(jnp.max(jnp.abs(logits - ref)))
    assert jnp.allclose(logits, ref, atol=2e-3, rtol=2e-3), f"max abs err {err}"

    print("KERNEL_OK")
</pallas_src>

<mosaic_0001>
module attributes {stable_mosaic.version = 11 : i64} {
  func.func @kernel(%arg0: i32, %arg1: memref<64x32xf32, #tpu.memory_space<vmem>>, %arg2: memref<32x96xf32, #tpu.memory_space<vmem>>, %arg3: memref<3x96xf32, #tpu.memory_space<vmem>>, %arg4: memref<32x64xf32, #tpu.memory_space<vmem>>, %arg5: memref<32x32xf32, #tpu.memory_space<vmem>>, %arg6: memref<32x16xf32, #tpu.memory_space<vmem>>, %arg7: memref<8x128xf32, #tpu.memory_space<vmem>>, %arg8: memref<64x16xf32, #tpu.memory_space<vmem>>) attributes {dimension_semantics = [#tpu.dimension_semantics<arbitrary>], iteration_bounds = array<i64: 1>, scalar_prefetch = 0 : i64, scratch_operands = 0 : i64, tpu.core_type = #tpu.core_type<tc>, window_params = [{pipeline_mode = #tpu.pipeline_mode<synchronous>, transform_indices = @transform_0, window_bounds = array<i64: 64, 32>}, {pipeline_mode = #tpu.pipeline_mode<synchronous>, transform_indices = @transform_1, window_bounds = array<i64: 32, 96>}, {pipeline_mode = #tpu.pipeline_mode<synchronous>, transform_indices = @transform_2, window_bounds = array<i64: 3, 96>}, {pipeline_mode = #tpu.pipeline_mode<synchronous>, transform_indices = @transform_3, window_bounds = array<i64: 32, 64>}, {pipeline_mode = #tpu.pipeline_mode<synchronous>, transform_indices = @transform_4, window_bounds = array<i64: 32, 32>}, {pipeline_mode = #tpu.pipeline_mode<synchronous>, transform_indices = @transform_5, window_bounds = array<i64: 32, 16>}, {pipeline_mode = #tpu.pipeline_mode<synchronous>, transform_indices = @transform_6, window_bounds = array<i64: 8, 128>}, {pipeline_mode = #tpu.pipeline_mode<synchronous>, transform_indices = @transform_7, window_bounds = array<i64: 64, 16>}]} {
    %c0 = arith.constant 0 : index
    %c0_0 = arith.constant 0 : index
    %0 = vector.load %arg7[%c0, %c0_0] : memref<8x128xf32, #tpu.memory_space<vmem>>, vector<1x32xf32>
    %c1 = arith.constant 1 : index
    %c0_1 = arith.constant 0 : index
    %1 = vector.load %arg7[%c1, %c0_1] : memref<8x128xf32, #tpu.memory_space<vmem>>, vector<1x32xf32>
    %c2 = arith.constant 2 : index
    %c0_2 = arith.constant 0 : index
    %2 = vector.load %arg7[%c2, %c0_2] : memref<8x128xf32, #tpu.memory_space<vmem>>, vector<1x32xf32>
    %c3 = arith.constant 3 : index
    %c0_3 = arith.constant 0 : index
    %3 = vector.load %arg7[%c3, %c0_3] : memref<8x128xf32, #tpu.memory_space<vmem>>, vector<1x32xf32>
    %c4 = arith.constant 4 : index
    %c0_4 = arith.constant 0 : index
    %4 = vector.load %arg7[%c4, %c0_4] : memref<8x128xf32, #tpu.memory_space<vmem>>, vector<1x32xf32>
    %c5 = arith.constant 5 : index
    %c0_5 = arith.constant 0 : index
    %5 = vector.load %arg7[%c5, %c0_5] : memref<8x128xf32, #tpu.memory_space<vmem>>, vector<1x16xf32>
    %c6 = arith.constant 6 : index
    %c0_6 = arith.constant 0 : index
    %6 = vector.load %arg7[%c6, %c0_6] : memref<8x128xf32, #tpu.memory_space<vmem>>, vector<1x96xf32>
    %c0_7 = arith.constant 0 : index
    %c0_8 = arith.constant 0 : index
    %7 = vector.load %arg1[%c0_7, %c0_8] : memref<64x32xf32, #tpu.memory_space<vmem>>, vector<64x32xf32>
    %cst = arith.constant dense<0.000000e+00> : vector<64xf32>
    %8 = vector.multi_reduction <add>, %7, %cst [1] : vector<64x32xf32> to vector<64xf32>
    %9 = vector.shape_cast %8 : vector<64xf32> to vector<64x1xf32>
    %cst_9 = arith.constant 3.200000e+01 : f32
    %10 = vector.broadcast %cst_9 : f32 to vector<64x1xf32>
    %11 = arith.divf %9, %10 : vector<64x1xf32>
    %12 = arith.mulf %7, %7 : vector<64x32xf32>
    %cst_10 = arith.constant dense<0.000000e+00> : vector<64xf32>
    %13 = vector.multi_reduction <add>, %12, %cst_10 [1] : vector<64x32xf32> to vector<64xf32>
    %14 = vector.shape_cast %13 : vector<64xf32> to vector<64x1xf32>
    %cst_11 = arith.constant 3.200000e+01 : f32
    %15 = vector.broadcast %cst_11 : f32 to vector<64x1xf32>
    %16 = arith.divf %14, %15 : vector<64x1xf32>
    %17 = arith.mulf %11, %11 : vector<64x1xf32>
    %18 = arith.subf %16, %17 : vector<64x1xf32>
    %19 = vector.broadcast %11 : vector<64x1xf32> to vector<64x32xf32>
    %20 = arith.subf %7, %19 : vector<64x32xf32>
    %cst_12 = arith.constant 9.99999974E-6 : f32
    %21 = vector.broadcast %cst_12 : f32 to vector<64x1xf32>
    %22 = arith.addf %18, %21 : vector<64x1xf32>
    %23 = math.rsqrt %22 : vector<64x1xf32>
    %24 = vector.broadcast %23 : vector<64x1xf32> to vector<64x32xf32>
    %25 = arith.mulf %20, %24 : vector<64x32xf32>
    %26 = vector.broadcast %0 : vector<1x32xf32> to vector<64x32xf32>
    %27 = arith.mulf %25, %26 : vector<64x32xf32>
    %28 = vector.broadcast %1 : vector<1x32xf32> to vector<64x32xf32>
    %29 = arith.addf %27, %28 : vector<64x32xf32>
    %c0_13 = arith.constant 0 : index
    %c0_14 = arith.constant 0 : index
    %30 = vector.load %arg2[%c0_13, %c0_14] : memref<32x96xf32, #tpu.memory_space<vmem>>, vector<32x96xf32>
    %cst_15 = arith.constant dense<0.000000e+00> : vector<64x96xf32>
    %31 = tpu.matmul %29, %30, %cst_15 {dimension_numbers = #tpu.dot_dimension_numbers<[1], [0], [0], [1], [0, 0, 1, 1], [], []>} : vector<64x32xf32>, vector<32x96xf32>, vector<64x96xf32> -> vector<64x96xf32>
    %32 = vector.broadcast %6 : vector<1x96xf32> to vector<64x96xf32>
    %33 = arith.addf %31, %32 : vector<64x96xf32>
    %34 = vector.extract_strided_slice %33 {offsets = [0, 0], sizes = [32, 96], strides = [1, 1]} : vector<64x96xf32> to vector<32x96xf32>
    %cst_16 = arith.constant 0.000000e+00 : f32
    %35 = vector.broadcast %cst_16 : f32 to vector<32x96xf32>
    %36 = tpu.concatenate %34, %35 in 0 : vector<32x96xf32>, vector<32x96xf32> -> vector<64x96xf32>
    %c0_17 = arith.constant 0 : index
    %c0_18 = arith.constant 0 : index
    %37 = vector.load %arg3[%c0_17, %c0_18] : memref<3x96xf32, #tpu.memory_space<vmem>>, vector<1x96xf32>
    %38 = vector.broadcast %37 : vector<1x96xf32> to vector<32x96xf32>
    %39 = arith.mulf %34, %38 : vector<32x96xf32>
    %c1_i32 = arith.constant 1 : i32
    %40 = tpu.dynamic_rotate %36 by %c1_i32 dim 0 : vector<64x96xf32>, i32 -> vector<64x96xf32>
    %41 = vector.extract_strided_slice %40 {offsets = [0, 0], sizes = [32, 96], strides = [1, 1]} : vector<64x96xf32> to vector<32x96xf32>
    %c1_19 = arith.constant 1 : index
    %c0_20 = arith.constant 0 : index
    %42 = vector.load %arg3[%c1_19, %c0_20] : memref<3x96xf32, #tpu.memory_space<vmem>>, vector<1x96xf32>
    %43 = vector.broadcast %42 : vector<1x96xf32> to vector<32x96xf32>
    %44 = arith.mulf %41, %43 : vector<32x96xf32>
    %45 = arith.addf %39, %44 : vector<32x96xf32>
    %c2_i32 = arith.constant 2 : i32
    %46 = tpu.dynamic_rotate %36 by %c2_i32 dim 0 : vector<64x96xf32>, i32 -> vector<64x96xf32>
    %47 = vector.extract_strided_slice %46 {offsets = [0, 0], sizes = [32, 96], strides = [1, 1]} : vector<64x96xf32> to vector<32x96xf32>
    %c2_21 = arith.constant 2 : index
    %c0_22 = arith.constant 0 : index
    %48 = vector.load %arg3[%c2_21, %c0_22] : memref<3x96xf32, #tpu.memory_space<vmem>>, vector<1x96xf32>
    %49 = vector.broadcast %48 : vector<1x96xf32> to vector<32x96xf32>
    %50 = arith.mulf %47, %49 : vector<32x96xf32>
    %51 = arith.addf %45, %50 : vector<32x96xf32>
    %52 = vector.extract_strided_slice %51 {offsets = [0, 0], sizes = [32, 32], strides = [1, 1]} : vector<32x96xf32> to vector<32x32xf32>
    %53 = vector.extract_strided_slice %51 {offsets = [0, 32], sizes = [32, 32], strides = [1, 1]} : vector<32x96xf32> to vector<32x32xf32>
    %54 = vector.extract_strided_slice %51 {offsets = [0, 64], sizes = [32, 32], strides = [1, 1]} : vector<32x96xf32> to vector<32x32xf32>
    %55 = arith.mulf %52, %54 : vector<32x32xf32>
    %56 = vector.extract_strided_slice %33 {offsets = [32, 0], sizes = [32, 96], strides = [1, 1]} : vector<64x96xf32> to vector<32x96xf32>
    %cst_23 = arith.constant 0.000000e+00 : f32
    %57 = vector.broadcast %cst_23 : f32 to vector<32x96xf32>
    %58 = tpu.concatenate %56, %57 in 0 : vector<32x96xf32>, vector<32x96xf32> -> vector<64x96xf32>
    %c0_24 = arith.constant 0 : index
    %c0_25 = arith.constant 0 : index
    %59 = vector.load %arg3[%c0_24, %c0_25] : memref<3x96xf32, #tpu.memory_space<vmem>>, vector<1x96xf32>
    %60 = vector.broadcast %59 : vector<1x96xf32> to vector<32x96xf32>
    %61 = arith.mulf %56, %60 : vector<32x96xf32>
    %c1_i32_26 = arith.constant 1 : i32
    %62 = tpu.dynamic_rotate %58 by %c1_i32_26 dim 0 : vector<64x96xf32>, i32 -> vector<64x96xf32>
    %63 = vector.extract_strided_slice %62 {offsets = [0, 0], sizes = [32, 96], strides = [1, 1]} : vector<64x96xf32> to vector<32x96xf32>
    %c1_27 = arith.constant 1 : index
    %c0_28 = arith.constant 0 : index
    %64 = vector.load %arg3[%c1_27, %c0_28] : memref<3x96xf32, #tpu.memory_space<vmem>>, vector<1x96xf32>
    %65 = vector.broadcast %64 : vector<1x96xf32> to vector<32x96xf32>
    %66 = arith.mulf %63, %65 : vector<32x96xf32>
    %67 = arith.addf %61, %66 : vector<32x96xf32>
    %c2_i32_29 = arith.constant 2 : i32
    %68 = tpu.dynamic_rotate %58 by %c2_i32_29 dim 0 : vector<64x96xf32>, i32 -> vector<64x96xf32>
    %69 = vector.extract_strided_slice %68 {offsets = [0, 0], sizes = [32, 96], strides = [1, 1]} : vector<64x96xf32> to vector<32x96xf32>
    %c2_30 = arith.constant 2 : index
    %c0_31 = arith.constant 0 : index
    %70 = vector.load %arg3[%c2_30, %c0_31] : memref<3x96xf32, #tpu.memory_space<vmem>>, vector<1x96xf32>
    %71 = vector.broadcast %70 : vector<1x96xf32> to vector<32x96xf32>
    %72 = arith.mulf %69, %71 : vector<32x96xf32>
    %73 = arith.addf %67, %72 : vector<32x96xf32>
    %74 = vector.extract_strided_slice %73 {offsets = [0, 0], sizes = [32, 32], strides = [1, 1]} : vector<32x96xf32> to vector<32x32xf32>
    %75 = vector.extract_strided_slice %73 {offsets = [0, 32], sizes = [32, 32], strides = [1, 1]} : vector<32x96xf32> to vector<32x32xf32>
    %76 = vector.extract_strided_slice %73 {offsets = [0, 64], sizes = [32, 32], strides = [1, 1]} : vector<32x96xf32> to vector<32x32xf32>
    %77 = arith.mulf %74, %76 : vector<32x32xf32>
    %78 = tpu.concatenate %55, %77 in 1 : vector<32x32xf32>, vector<32x32xf32> -> vector<32x64xf32>
    %cst_32 = arith.constant 0.000000e+00 : f32
    %79 = vector.broadcast %cst_32 : f32 to vector<32x64xf32>
    %80 = tpu.concatenate %78, %79 in 0 : vector<32x64xf32>, vector<32x64xf32> -> vector<64x64xf32>
    %c0_33 = arith.constant 0 : index
    %c0_34 = arith.constant 0 : index
    %81 = vector.load %arg4[%c0_33, %c0_34] : memref<32x64xf32, #tpu.memory_space<vmem>>, vector<1x64xf32>
    %82 = vector.broadcast %81 : vector<1x64xf32> to vector<32x64xf32>
    %83 = arith.mulf %78, %82 : vector<32x64xf32>
    %cst_35 = arith.constant 0.000000e+00 : f32
    %84 = vector.broadcast %cst_35 : f32 to vector<32x64xf32>
    %cst_36 = arith.constant 0.000000e+00 : f32
    %85 = vector.broadcast %cst_36 : f32 to vector<32x64xf32>
    %cst_37 = arith.constant 0.000000e+00 : f32
    %86 = vector.broadcast %cst_37 : f32 to vector<32x64xf32>
    %c1_i32_38 = arith.constant 1 : i32
    %87 = tpu.dynamic_rotate %80 by %c1_i32_38 dim 0 : vector<64x64xf32>, i32 -> vector<64x64xf32>
    %88 = vector.extract_strided_slice %87 {offsets = [0, 0], sizes = [32, 64], strides = [1, 1]} : vector<64x64xf32> to vector<32x64xf32>
    %c1_39 = arith.constant 1 : index
    %c0_40 = arith.constant 0 : index
    %89 = vector.load %arg4[%c1_39, %c0_40] : memref<32x64xf32, #tpu.memory_space<vmem>>, vector<1x64xf32>
    %90 = vector.broadcast %89 : vector<1x64xf32> to vector<32x64xf32>
    %91 = arith.mulf %88, %90 : vector<32x64xf32>
    %92 = arith.addf %84, %91 : vector<32x64xf32>
    %c2_i32_41 = arith.constant 2 : i32
    %93 = tpu.dynamic_rotate %80 by %c2_i32_41 dim 0 : vector<64x64xf32>, i32 -> vector<64x64xf32>
    %94 = vector.extract_strided_slice %93 {offsets = [0, 0], sizes = [32, 64], strides = [1, 1]} : vector<64x64xf32> to vector<32x64xf32>
    %c2_42 = arith.constant 2 : index
    %c0_43 = arith.constant 0 : index
    %95 = vector.load %arg4[%c2_42, %c0_43] : memref<32x64xf32, #tpu.memory_space<vmem>>, vector<1x64xf32>
    %96 = vector.broadcast %95 : vector<1x64xf32> to vector<32x64xf32>
    %97 = arith.mulf %94, %96 : vector<32x64xf32>
    %98 = arith.addf %85, %97 : vector<32x64xf32>
    %c3_i32 = arith.constant 3 : i32
    %99 = tpu.dynamic_rotate %80 by %c3_i32 dim 0 : vector<64x64xf32>, i32 -> vector<64x64xf32>
    %100 = vector.extract_strided_slice %99 {offsets = [0, 0], sizes = [32, 64], strides = [1, 1]} : vector<64x64xf32> to vector<32x64xf32>
    %c3_44 = arith.constant 3 : index
    %c0_45 = arith.constant 0 : index
    %101 = vector.load %arg4[%c3_44, %c0_45] : memref<32x64xf32, #tpu.memory_space<vmem>>, vector<1x64xf32>
    %102 = vector.broadcast %101 : vector<1x64xf32> to vector<32x64xf32>
    %103 = arith.mulf %100, %102 : vector<32x64xf32>
    %104 = arith.addf %86, %103 : vector<32x64xf32>
    %c4_i32 = arith.constant 4 : i32
    %105 = tpu.dynamic_rotate %80 by %c4_i32 dim 0 : vector<64x64xf32>, i32 -> vector<64x64xf32>
    %106 = vector.extract_strided_slice %105 {offsets = [0, 0], sizes = [32, 64], strides = [1, 1]} : vector<64x64xf32> to vector<32x64xf32>
    %c4_46 = arith.constant 4 : index
    %c0_47 = arith.constant 0 : index
    %107 = vector.load %arg4[%c4_46, %c0_47] : memref<32x64xf32, #tpu.memory_space<vmem>>, vector<1x64xf32>
    %108 = vector.broadcast %107 : vector<1x64xf32> to vector<32x64xf32>
    %109 = arith.mulf %106, %108 : vector<32x64xf32>
    %110 = arith.addf %83, %109 : vector<32x64xf32>
    %c5_i32 = arith.constant 5 : i32
    %111 = tpu.dynamic_rotate %80 by %c5_i32 dim 0 : vector<64x64xf32>, i32 -> vector<64x64xf32>
    %112 = vector.extract_strided_slice %111 {offsets = [0, 0], sizes = [32, 64], strides = [1, 1]} : vector<64x64xf32> to vector<32x64xf32>
    %c5_48 = arith.constant 5 : index
    %c0_49 = arith.constant 0 : index
    %113 = vector.load %arg4[%c5_48, %c0_49] : memref<32x64xf32, #tpu.memory_space<vmem>>, vector<1x64xf32>
    %114 = vector.broadcast %113 : vector<1x64xf32> to vector<32x64xf32>
    %115 = arith.mulf %112, %114 : vector<32x64xf32>
    %116 = arith.addf %92, %115 : vector<32x64xf32>
    %c6_i32 = arith.constant 6 : i32
    %117 = tpu.dynamic_rotate %80 by %c6_i32 dim 0 : vector<64x64xf32>, i32 -> vector<64x64xf32>
    %118 = vector.extract_strided_slice %117 {offsets = [0, 0], sizes = [32, 64], strides = [1, 1]} : vector<64x64xf32> to vector<32x64xf32>
    %c6_50 = arith.constant 6 : index
    %c0_51 = arith.constant 0 : index
    %119 = vector.load %arg4[%c6_50, %c0_51] : memref<32x64xf32, #tpu.memory_space<vmem>>, vector<1x64xf32>
    %120 = vector.broadcast %119 : vector<1x64xf32> to vector<32x64xf32>
    %121 = arith.mulf %118, %120 : vector<32x64xf32>
    %122 = arith.addf %98, %121 : vector<32x64xf32>
    %c7_i32 = arith.constant 7 : i32
    %123 = tpu.dynamic_rotate %80 by %c7_i32 dim 0 : vector<64x64xf32>, i32 -> vector<64x64xf32>
    %124 = vector.extract_strided_slice %123 {offsets = [0, 0], sizes = [32, 64], strides = [1, 1]} : vector<64x64xf32> to vector<32x64xf32>
    %c7 = arith.constant 7 : index
    %c0_52 = arith.constant 0 : index
    %125 = vector.load %arg4[%c7, %c0_52] : memref<32x64xf32, #tpu.memory_space<vmem>>, vector<1x64xf32>
    %126 = vector.broadcast %125 : vector<1x64xf32> to vector<32x64xf32>
    %127 = arith.mulf %124, %126 : vector<32x64xf32>
    %128 = arith.addf %104, %127 : vector<32x64xf32>
    %c8_i32 = arith.constant 8 : i32
    %129 = tpu.dynamic_rotate %80 by %c8_i32 dim 0 : vector<64x64xf32>, i32 -> vector<64x64xf32>
    %130 = vector.extract_strided_slice %129 {offsets = [0, 0], sizes = [32, 64], strides = [1, 1]} : vector<64x64xf32> to vector<32x64xf32>
    %c8 = arith.constant 8 : index
    %c0_53 = arith.constant 0 : index
    %131 = vector.load %arg4[%c8, %c0_53] : memref<32x64xf32, #tpu.memory_space<vmem>>, vector<1x64xf32>
    %132 = vector.broadcast %131 : vector<1x64xf32> to vector<32x64xf32>
    %133 = arith.mulf %130, %132 : vector<32x64xf32>
    %134 = arith.addf %110, %133 : vector<32x64xf32>
    %c9_i32 = arith.constant 9 : i32
    %135 = tpu.dynamic_rotate %80 by %c9_i32 dim 0 : vector<64x64xf32>, i32 -> vector<64x64xf32>
    %136 = vector.extract_strided_slice %135 {offsets = [0, 0], sizes = [32, 64], strides = [1, 1]} : vector<64x64xf32> to vector<32x64xf32>
    %c9 = arith.constant 9 : index
    %c0_54 = arith.constant 0 : index
    %137 = vector.load %arg4[%c9, %c0_54] : memref<32x64xf32, #tpu.memory_space<vmem>>, vector<1x64xf32>
    %138 = vector.broadcast %137 : vector<1x64xf32> to vector<32x64xf32>
    %139 = arith.mulf %136, %138 : vector<32x64xf32>
    %140 = arith.addf %116, %139 : vector<32x64xf32>
    %c10_i32 = arith.constant 10 : i32
    %141 = tpu.dynamic_rotate %80 by %c10_i32 dim 0 : vector<64x64xf32>, i32 -> vector<64x64xf32>
    %142 = vector.extract_strided_slice %141 {offsets = [0, 0], sizes = [32, 64], strides = [1, 1]} : vector<64x64xf32> to vector<32x64xf32>
    %c10 = arith.constant 10 : index
    %c0_55 = arith.constant 0 : index
    %143 = vector.load %arg4[%c10, %c0_55] : memref<32x64xf32, #tpu.memory_space<vmem>>, vector<1x64xf32>
    %144 = vector.broadcast %143 : vector<1x64xf32> to vector<32x64xf32>
    %145 = arith.mulf %142, %144 : vector<32x64xf32>
    %146 = arith.addf %122, %145 : vector<32x64xf32>
    %c11_i32 = arith.constant 11 : i32
    %147 = tpu.dynamic_rotate %80 by %c11_i32 dim 0 : vector<64x64xf32>, i32 -> vector<64x64xf32>
    %148 = vector.extract_strided_slice %147 {offsets = [0, 0], sizes = [32, 64], strides = [1, 1]} : vector<64x64xf32> to vector<32x64xf32>
    %c11 = arith.constant 11 : index
    %c0_56 = arith.constant 0 : index
    %149 = vector.load %arg4[%c11, %c0_56] : memref<32x64xf32, #tpu.memory_space<vmem>>, vector<1x64xf32>
    %150 = vector.broadcast %149 : vector<1x64xf32> to vector<32x64xf32>
    %151 = arith.mulf %148, %150 : vector<32x64xf32>
    %152 = arith.addf %128, %151 : vector<32x64xf32>
    %c12_i32 = arith.constant 12 : i32
    %153 = tpu.dynamic_rotate %80 by %c12_i32 dim 0 : vector<64x64xf32>, i32 -> vector<64x64xf32>
    %154 = vector.extract_strided_slice %153 {offsets = [0, 0], sizes = [32, 64], strides = [1, 1]} : vector<64x64xf32> to vector<32x64xf32>
    %c12 = arith.constant 12 : index
    %c0_57 = arith.constant 0 : index
    %155 = vector.load %arg4[%c12, %c0_57] : memref<32x64xf32, #tpu.memory_space<vmem>>, vector<1x64xf32>
    %156 = vector.broadcast %155 : vector<1x64xf32> to vector<32x64xf32>
    %157 = arith.mulf %154, %156 : vector<32x64xf32>
    %158 = arith.addf %134, %157 : vector<32x64xf32>
    %c13_i32 = arith.constant 13 : i32
    %159 = tpu.dynamic_rotate %80 by %c13_i32 dim 0 : vector<64x64xf32>, i32 -> vector<64x64xf32>
    %160 = vector.extract_strided_slice %159 {offsets = [0, 0], sizes = [32, 64], strides = [1, 1]} : vector<64x64xf32> to vector<32x64xf32>
    %c13 = arith.constant 13 : index
    %c0_58 = arith.constant 0 : index
    %161 = vector.load %arg4[%c13, %c0_58] : memref<32x64xf32, #tpu.memory_space<vmem>>, vector<1x64xf32>
    %162 = vector.broadcast %161 : vector<1x64xf32> to vector<32x64xf32>
    %163 = arith.mulf %160, %162 : vector<32x64xf32>
    %164 = arith.addf %140, %163 : vector<32x64xf32>
    %c14_i32 = arith.constant 14 : i32
    %165 = tpu.dynamic_rotate %80 by %c14_i32 dim 0 : vector<64x64xf32>, i32 -> vector<64x64xf32>
    %166 = vector.extract_strided_slice %165 {offsets = [0, 0], sizes = [32, 64], strides = [1, 1]} : vector<64x64xf32> to vector<32x64xf32>
    %c14 = arith.constant 14 : index
    %c0_59 = arith.constant 0 : index
    %167 = vector.load %arg4[%c14, %c0_59] : memref<32x64xf32, #tpu.memory_space<vmem>>, vector<1x64xf32>
    %168 = vector.broadcast %167 : vector<1x64xf32> to vector<32x64xf32>
    %169 = arith.mulf %166, %168 : vector<32x64xf32>
    %170 = arith.addf %146, %169 : vector<32x64xf32>
    %c15_i32 = arith.constant 15 : i32
    %171 = tpu.dynamic_rotate %80 by %c15_i32 dim 0 : vector<64x64xf32>, i32 -> vector<64x64xf32>
    %172 = vector.extract_strided_slice %171 {offsets = [0, 0], sizes = [32, 64], strides = [1, 1]} : vector<64x64xf32> to vector<32x64xf32>
    %c15 = arith.constant 15 : index
    %c0_60 = arith.constant 0 : index
    %173 = vector.load %arg4[%c15, %c0_60] : memref<32x64xf32, #tpu.memory_space<vmem>>, vector<1x64xf32>
    %174 = vector.broadcast %173 : vector<1x64xf32> to vector<32x64xf32>
    %175 = arith.mulf %172, %174 : vector<32x64xf32>
    %176 = arith.addf %152, %175 : vector<32x64xf32>
    %c16_i32 = arith.constant 16 : i32
    %177 = tpu.dynamic_rotate %80 by %c16_i32 dim 0 : vector<64x64xf32>, i32 -> vector<64x64xf32>
    %178 = vector.extract_strided_slice %177 {offsets = [0, 0], sizes = [32, 64], strides = [1, 1]} : vector<64x64xf32> to vector<32x64xf32>
    %c16 = arith.constant 16 : index
    %c0_61 = arith.constant 0 : index
    %179 = vector.load %arg4[%c16, %c0_61] : memref<32x64xf32, #tpu.memory_space<vmem>>, vector<1x64xf32>
    %180 = vector.broadcast %179 : vector<1x64xf32> to vector<32x64xf32>
    %181 = arith.mulf %178, %180 : vector<32x64xf32>
    %182 = arith.addf %158, %181 : vector<32x64xf32>
    %c17_i32 = arith.constant 17 : i32
    %183 = tpu.dynamic_rotate %80 by %c17_i32 dim 0 : vector<64x64xf32>, i32 -> vector<64x64xf32>
    %184 = vector.extract_strided_slice %183 {offsets = [0, 0], sizes = [32, 64], strides = [1, 1]} : vector<64x64xf32> to vector<32x64xf32>
    %c17 = arith.constant 17 : index
    %c0_62 = arith.constant 0 : index
    %185 = vector.load %arg4[%c17, %c0_62] : memref<32x64xf32, #tpu.memory_space<vmem>>, vector<1x64xf32>
    %186 = vector.broadcast %185 : vector<1x64xf32> to vector<32x64xf32>
    %187 = arith.mulf %184, %186 : vector<32x64xf32>
    %188 = arith.addf %164, %187 : vector<32x64xf32>
    %c18_i32 = arith.constant 18 : i32
    %189 = tpu.dynamic_rotate %80 by %c18_i32 dim 0 : vector<64x64xf32>, i32 -> vector<64x64xf32>
    %190 = vector.extract_strided_slice %189 {offsets = [0, 0], sizes = [32, 64], strides = [1, 1]} : vector<64x64xf32> to vector<32x64xf32>
    %c18 = arith.constant 18 : index
    %c0_63 = arith.constant 0 : index
    %191 = vector.load %arg4[%c18, %c0_63] : memref<32x64xf32, #tpu.memory_space<vmem>>, vector<1x64xf32>
    %192 = vector.broadcast %191 : vector<1x64xf32> to vector<32x64xf32>
    %193 = arith.mulf %190, %192 : vector<32x64xf32>
    %194 = arith.addf %170, %193 : vector<32x64xf32>
    %c19_i32 = arith.constant 19 : i32
    %195 = tpu.dynamic_rotate %80 by %c19_i32 dim 0 : vector<64x64xf32>, i32 -> vector<64x64xf32>
    %196 = vector.extract_strided_slice %195 {offsets = [0, 0], sizes = [32, 64], strides = [1, 1]} : vector<64x64xf32> to vector<32x64xf32>
    %c19 = arith.constant 19 : index
    %c0_64 = arith.constant 0 : index
    %197 = vector.load %arg4[%c19, %c0_64] : memref<32x64xf32, #tpu.memory_space<vmem>>, vector<1x64xf32>
    %198 = vector.broadcast %197 : vector<1x64xf32> to vector<32x64xf32>
    %199 = arith.mulf %196, %198 : vector<32x64xf32>
    %200 = arith.addf %176, %199 : vector<32x64xf32>
    %c20_i32 = arith.constant 20 : i32
    %201 = tpu.dynamic_rotate %80 by %c20_i32 dim 0 : vector<64x64xf32>, i32 -> vector<64x64xf32>
    %202 = vector.extract_strided_slice %201 {offsets = [0, 0], sizes = [32, 64], strides = [1, 1]} : vector<64x64xf32> to vector<32x64xf32>
    %c20 = arith.constant 20 : index
    %c0_65 = arith.constant 0 : index
    %203 = vector.load %arg4[%c20, %c0_65] : memref<32x64xf32, #tpu.memory_space<vmem>>, vector<1x64xf32>
    %204 = vector.broadcast %203 : vector<1x64xf32> to vector<32x64xf32>
    %205 = arith.mulf %202, %204 : vector<32x64xf32>
    %206 = arith.addf %182, %205 : vector<32x64xf32>
    %c21_i32 = arith.constant 21 : i32
    %207 = tpu.dynamic_rotate %80 by %c21_i32 dim 0 : vector<64x64xf32>, i32 -> vector<64x64xf32>
    %208 = vector.extract_strided_slice %207 {offsets = [0, 0], sizes = [32, 64], strides = [1, 1]} : vector<64x64xf32> to vector<32x64xf32>
    %c21 = arith.constant 21 : index
    %c0_66 = arith.constant 0 : index
    %209 = vector.load %arg4[%c21, %c0_66] : memref<32x64xf32, #tpu.memory_space<vmem>>, vector<1x64xf32>
    %210 = vector.broadcast %209 : vector<1x64xf32> to vector<32x64xf32>
    %211 = arith.mulf %208, %210 : vector<32x64xf32>
    %212 = arith.addf %188, %211 : vector<32x64xf32>
    %c22_i32 = arith.constant 22 : i32
    %213 = tpu.dynamic_rotate %80 by %c22_i32 dim 0 : vector<64x64xf32>, i32 -> vector<64x64xf32>
    %214 = vector.extract_strided_slice %213 {offsets = [0, 0], sizes = [32, 64], strides = [1, 1]} : vector<64x64xf32> to vector<32x64xf32>
    %c22 = arith.constant 22 : index
    %c0_67 = arith.constant 0 : index
    %215 = vector.load %arg4[%c22, %c0_67] : memref<32x64xf32, #tpu.memory_space<vmem>>, vector<1x64xf32>
    %216 = vector.broadcast %215 : vector<1x64xf32> to vector<32x64xf32>
    %217 = arith.mulf %214, %216 : vector<32x64xf32>
    %218 = arith.addf %194, %217 : vector<32x64xf32>
    %c23_i32 = arith.constant 23 : i32
    %219 = tpu.dynamic_rotate %80 by %c23_i32 dim 0 : vector<64x64xf32>, i32 -> vector<64x64xf32>
    %220 = vector.extract_strided_slice %219 {offsets = [0, 0], sizes = [32, 64], strides = [1, 1]} : vector<64x64xf32> to vector<32x64xf32>
    %c23 = arith.constant 23 : index
    %c0_68 = arith.constant 0 : index
    %221 = vector.load %arg4[%c23, %c0_68] : memref<32x64xf32, #tpu.memory_space<vmem>>, vector<1x64xf32>
    %222 = vector.broadcast %221 : vector<1x64xf32> to vector<32x64xf32>
    %223 = arith.mulf %220, %222 : vector<32x64xf32>
    %224 = arith.addf %200, %223 : vector<32x64xf32>
    %c24_i32 = arith.constant 24 : i32
    %225 = tpu.dynamic_rotate %80 by %c24_i32 dim 0 : vector<64x64xf32>, i32 -> vector<64x64xf32>
    %226 = vector.extract_strided_slice %225 {offsets = [0, 0], sizes = [32, 64], strides = [1, 1]} : vector<64x64xf32> to vector<32x64xf32>
    %c24 = arith.constant 24 : index
    %c0_69 = arith.constant 0 : index
    %227 = vector.load %arg4[%c24, %c0_69] : memref<32x64xf32, #tpu.memory_space<vmem>>, vector<1x64xf32>
    %228 = vector.broadcast %227 : vector<1x64xf32> to vector<32x64xf32>
    %229 = arith.mulf %226, %228 : vector<32x64xf32>
    %230 = arith.addf %206, %229 : vector<32x64xf32>
    %c25_i32 = arith.constant 25 : i32
    %231 = tpu.dynamic_rotate %80 by %c25_i32 dim 0 : vector<64x64xf32>, i32 -> vector<64x64xf32>
    %232 = vector.extract_strided_slice %231 {offsets = [0, 0], sizes = [32, 64], strides = [1, 1]} : vector<64x64xf32> to vector<32x64xf32>
    %c25 = arith.constant 25 : index
    %c0_70 = arith.constant 0 : index
    %233 = vector.load %arg4[%c25, %c0_70] : memref<32x64xf32, #tpu.memory_space<vmem>>, vector<1x64xf32>
    %234 = vector.broadcast %233 : vector<1x64xf32> to vector<32x64xf32>
    %235 = arith.mulf %232, %234 : vector<32x64xf32>
    %236 = arith.addf %212, %235 : vector<32x64xf32>
    %c26_i32 = arith.constant 26 : i32
    %237 = tpu.dynamic_rotate %80 by %c26_i32 dim 0 : vector<64x64xf32>, i32 -> vector<64x64xf32>
    %238 = vector.extract_strided_slice %237 {offsets = [0, 0], sizes = [32, 64], strides = [1, 1]} : vector<64x64xf32> to vector<32x64xf32>
    %c26 = arith.constant 26 : index
    %c0_71 = arith.constant 0 : index
    %239 = vector.load %arg4[%c26, %c0_71] : memref<32x64xf32, #tpu.memory_space<vmem>>, vector<1x64xf32>
    %240 = vector.broadcast %239 : vector<1x64xf32> to vector<32x64xf32>
    %241 = arith.mulf %238, %240 : vector<32x64xf32>
    %242 = arith.addf %218, %241 : vector<32x64xf32>
    %c27_i32 = arith.constant 27 : i32
    %243 = tpu.dynamic_rotate %80 by %c27_i32 dim 0 : vector<64x64xf32>, i32 -> vector<64x64xf32>
    %244 = vector.extract_strided_slice %243 {offsets = [0, 0], sizes = [32, 64], strides = [1, 1]} : vector<64x64xf32> to vector<32x64xf32>
    %c27 = arith.constant 27 : index
    %c0_72 = arith.constant 0 : index
    %245 = vector.load %arg4[%c27, %c0_72] : memref<32x64xf32, #tpu.memory_space<vmem>>, vector<1x64xf32>
    %246 = vector.broadcast %245 : vector<1x64xf32> to vector<32x64xf32>
    %247 = arith.mulf %244, %246 : vector<32x64xf32>
    %248 = arith.addf %224, %247 : vector<32x64xf32>
    %c28_i32 = arith.constant 28 : i32
    %249 = tpu.dynamic_rotate %80 by %c28_i32 dim 0 : vector<64x64xf32>, i32 -> vector<64x64xf32>
    %250 = vector.extract_strided_slice %249 {offsets = [0, 0], sizes = [32, 64], strides = [1, 1]} : vector<64x64xf32> to vector<32x64xf32>
    %c28 = arith.constant 28 : index
    %c0_73 = arith.constant 0 : index
    %251 = vector.load %arg4[%c28, %c0_73] : memref<32x64xf32, #tpu.memory_space<vmem>>, vector<1x64xf32>
    %252 = vector.broadcast %251 : vector<1x64xf32> to vector<32x64xf32>
    %253 = arith.mulf %250, %252 : vector<32x64xf32>
    %254 = arith.addf %230, %253 : vector<32x64xf32>
    %c29_i32 = arith.constant 29 : i32
    %255 = tpu.dynamic_rotate %80 by %c29_i32 dim 0 : vector<64x64xf32>, i32 -> vector<64x64xf32>
    %256 = vector.extract_strided_slice %255 {offsets = [0, 0], sizes = [32, 64], strides = [1, 1]} : vector<64x64xf32> to vector<32x64xf32>
    %c29 = arith.constant 29 : index
    %c0_74 = arith.constant 0 : index
    %257 = vector.load %arg4[%c29, %c0_74] : memref<32x64xf32, #tpu.memory_space<vmem>>, vector<1x64xf32>
    %258 = vector.broadcast %257 : vector<1x64xf32> to vector<32x64xf32>
    %259 = arith.mulf %256, %258 : vector<32x64xf32>
    %260 = arith.addf %236, %259 : vector<32x64xf32>
    %c30_i32 = arith.constant 30 : i32
    %261 = tpu.dynamic_rotate %80 by %c30_i32 dim 0 : vector<64x64xf32>, i32 -> vector<64x64xf32>
    %262 = vector.extract_strided_slice %261 {offsets = [0, 0], sizes = [32, 64], strides = [1, 1]} : vector<64x64xf32> to vector<32x64xf32>
    %c30 = arith.constant 30 : index
    %c0_75 = arith.constant 0 : index
    %263 = vector.load %arg4[%c30, %c0_75] : memref<32x64xf32, #tpu.memory_space<vmem>>, vector<1x64xf32>
    %264 = vector.broadcast %263 : vector<1x64xf32> to vector<32x64xf32>
    %265 = arith.mulf %262, %264 : vector<32x64xf32>
    %266 = arith.addf %242, %265 : vector<32x64xf32>
    %c31_i32 = arith.constant 31 : i32
    %267 = tpu.dynamic_rotate %80 by %c31_i32 dim 0 : vector<64x64xf32>, i32 -> vector<64x64xf32>
    %268 = vector.extract_strided_slice %267 {offsets = [0, 0], sizes = [32, 64], strides = [1, 1]} : vector<64x64xf32> to vector<32x64xf32>
    %c31 = arith.constant 31 : index
    %c0_76 = arith.constant 0 : index
    %269 = vector.load %arg4[%c31, %c0_76] : memref<32x64xf32, #tpu.memory_space<vmem>>, vector<1x64xf32>
    %270 = vector.broadcast %269 : vector<1x64xf32> to vector<32x64xf32>
    %271 = arith.mulf %268, %270 : vector<32x64xf32>
    %272 = arith.addf %248, %271 : vector<32x64xf32>
    %273 = arith.addf %254, %260 : vector<32x64xf32>
    %274 = arith.addf %273, %266 : vector<32x64xf32>
    %275 = arith.addf %274, %272 : vector<32x64xf32>
    %276 = vector.extract_strided_slice %275 {offsets = [0, 0], sizes = [32, 32], strides = [1, 1]} : vector<32x64xf32> to vector<32x32xf32>
    %277 = arith.mulf %53, %276 : vector<32x32xf32>
    %278 = vector.extract_strided_slice %275 {offsets = [0, 32], sizes = [32, 32], strides = [1, 1]} : vector<32x64xf32> to vector<32x32xf32>
    %279 = arith.mulf %75, %278 : vector<32x32xf32>
    %280 = tpu.concatenate %277, %279 in 0 : vector<32x32xf32>, vector<32x32xf32> -> vector<64x32xf32>
    %c0_77 = arith.constant 0 : index
    %c0_78 = arith.constant 0 : index
    %281 = vector.load %arg5[%c0_77, %c0_78] : memref<32x32xf32, #tpu.memory_space<vmem>>, vector<32x32xf32>
    %cst_79 = arith.constant dense<0.000000e+00> : vector<64x32xf32>
    %282 = tpu.matmul %280, %281, %cst_79 {dimension_numbers = #tpu.dot_dimension_numbers<[1], [0], [0], [1], [0, 0, 1, 1], [], []>} : vector<64x32xf32>, vector<32x32xf32>, vector<64x32xf32> -> vector<64x32xf32>
    %283 = vector.broadcast %2 : vector<1x32xf32> to vector<64x32xf32>
    %284 = arith.addf %282, %283 : vector<64x32xf32>
    %285 = arith.addf %7, %284 : vector<64x32xf32>
    %cst_80 = arith.constant dense<0.000000e+00> : vector<64xf32>
    %286 = vector.multi_reduction <add>, %285, %cst_80 [1] : vector<64x32xf32> to vector<64xf32>
    %287 = vector.shape_cast %286 : vector<64xf32> to vector<64x1xf32>
    %cst_81 = arith.constant 3.200000e+01 : f32
    %288 = vector.broadcast %cst_81 : f32 to vector<64x1xf32>
    %289 = arith.divf %287, %288 : vector<64x1xf32>
    %290 = arith.mulf %285, %285 : vector<64x32xf32>
    %cst_82 = arith.constant dense<0.000000e+00> : vector<64xf32>
    %291 = vector.multi_reduction <add>, %290, %cst_82 [1] : vector<64x32xf32> to vector<64xf32>
    %292 = vector.shape_cast %291 : vector<64xf32> to vector<64x1xf32>
    %cst_83 = arith.constant 3.200000e+01 : f32
    %293 = vector.broadcast %cst_83 : f32 to vector<64x1xf32>
    %294 = arith.divf %292, %293 : vector<64x1xf32>
    %295 = arith.mulf %289, %289 : vector<64x1xf32>
    %296 = arith.subf %294, %295 : vector<64x1xf32>
    %297 = vector.broadcast %289 : vector<64x1xf32> to vector<64x32xf32>
    %298 = arith.subf %285, %297 : vector<64x32xf32>
    %cst_84 = arith.constant 9.99999974E-6 : f32
    %299 = vector.broadcast %cst_84 : f32 to vector<64x1xf32>
    %300 = arith.addf %296, %299 : vector<64x1xf32>
    %301 = math.rsqrt %300 : vector<64x1xf32>
    %302 = vector.broadcast %301 : vector<64x1xf32> to vector<64x32xf32>
    %303 = arith.mulf %298, %302 : vector<64x32xf32>
    %304 = vector.broadcast %3 : vector<1x32xf32> to vector<64x32xf32>
    %305 = arith.mulf %303, %304 : vector<64x32xf32>
    %306 = vector.broadcast %4 : vector<1x32xf32> to vector<64x32xf32>
    %307 = arith.addf %305, %306 : vector<64x32xf32>
    %c0_85 = arith.constant 0 : index
    %c0_86 = arith.constant 0 : index
    %308 = vector.load %arg6[%c0_85, %c0_86] : memref<32x16xf32, #tpu.memory_space<vmem>>, vector<32x16xf32>
    %cst_87 = arith.constant dense<0.000000e+00> : vector<64x16xf32>
    %309 = tpu.matmul %307, %308, %cst_87 {dimension_numbers = #tpu.dot_dimension_numbers<[1], [0], [0], [1], [0, 0, 1, 1], [], []>} : vector<64x32xf32>, vector<32x16xf32>, vector<64x16xf32> -> vector<64x16xf32>
    %310 = vector.broadcast %5 : vector<1x16xf32> to vector<64x16xf32>
    %311 = arith.addf %309, %310 : vector<64x16xf32>
    %c0_88 = arith.constant 0 : index
    %c0_89 = arith.constant 0 : index
    %312 = vector.load %arg8[%c0_88, %c0_89] : memref<64x16xf32, #tpu.memory_space<vmem>>, vector<64x16xf32>
    tpu.vector_store %arg8[%c0_88, %c0_89], %311 {strides = array<i32>} : memref<64x16xf32, #tpu.memory_space<vmem>>, vector<64x16xf32>,
    return
  }
  func.func @transform_0(%arg0: i32) -> (i32, i32) {
    %c0_i32 = arith.constant 0 : i32
    %c0_i32_0 = arith.constant 0 : i32
    %c0_i32_1 = arith.constant 0 : i32
    return %c0_i32, %c0_i32_0 : i32, i32
  }
  func.func @transform_1(%arg0: i32) -> (i32, i32) {
    %c0_i32 = arith.constant 0 : i32
    %c0_i32_0 = arith.constant 0 : i32
    %c0_i32_1 = arith.constant 0 : i32
    return %c0_i32, %c0_i32_0 : i32, i32
  }
  func.func @transform_2(%arg0: i32) -> (i32, i32) {
    %c0_i32 = arith.constant 0 : i32
    %c0_i32_0 = arith.constant 0 : i32
    %c0_i32_1 = arith.constant 0 : i32
    return %c0_i32, %c0_i32_0 : i32, i32
  }
  func.func @transform_3(%arg0: i32) -> (i32, i32) {
    %c0_i32 = arith.constant 0 : i32
    %c0_i32_0 = arith.constant 0 : i32
    %c0_i32_1 = arith.constant 0 : i32
    return %c0_i32, %c0_i32_0 : i32, i32
  }
  func.func @transform_4(%arg0: i32) -> (i32, i32) {
    %c0_i32 = arith.constant 0 : i32
    %c0_i32_0 = arith.constant 0 : i32
    %c0_i32_1 = arith.constant 0 : i32
    return %c0_i32, %c0_i32_0 : i32, i32
  }
  func.func @transform_5(%arg0: i32) -> (i32, i32) {
    %c0_i32 = arith.constant 0 : i32
    %c0_i32_0 = arith.constant 0 : i32
    %c0_i32_1 = arith.constant 0 : i32
    return %c0_i32, %c0_i32_0 : i32, i32
  }
  func.func @transform_6(%arg0: i32) -> (i32, i32) {
    %c0_i32 = arith.constant 0 : i32
    %c0_i32_0 = arith.constant 0 : i32
    %c0_i32_1 = arith.constant 0 : i32
    return %c0_i32, %c0_i32_0 : i32, i32
  }
  func.func @transform_7(%arg0: i32) -> (i32, i32) {
    %c0_i32 = arith.constant 0 : i32
    %c0_i32_0 = arith.constant 0 : i32
    %c0_i32_1 = arith.constant 0 : i32
    return %c0_i32, %c0_i32_0 : i32, i32
  }
}

</mosaic_0001>

<bundles_post_ra>
// kernel: tpu_custom_call.1
= control target key start
LH: loop header
LB: loop body
LE: loop exit
PB: predicated region body
PF: predicated region fallthrough
CT: control target
= control target key end

     0   :  { %vm41_vm0 = vcmask 261120   ;;  %s1649_s13 = smov 32   ;;  %vm1402_vm8 = vcmask 130048   ;;  %s2825_s0 = inlined_call_operand.vmem [shape: f32[64,32], index: 0, kind: input, shape index: {}]   ;;  %s2826_s1 = inlined_call_operand.vmem [shape: f32[32,96], index: 1, kind: input, shape index: {}]   ;;  %s2827_s6 = inlined_call_operand.vmem [shape: f32[8,128], index: 6, kind: input, shape index: {}]   ;;  %s2828_s2 = inlined_call_operand.vmem [shape: f32[3,96], index: 2, kind: input, shape index: {}]   ;;  %s2829_s3 = inlined_call_operand.vmem [shape: f32[32,64], index: 3, kind: input, shape index: {}]   ;;  %s2830_s4 = inlined_call_operand.vmem [shape: f32[32,32], index: 4, kind: input, shape index: {}]   ;;  %s2831_s5 = inlined_call_operand.vmem [shape: f32[32,16], index: 5, kind: input, shape index: {}]   ;;  %s2832_s7 = inlined_call_operand.vmem [shape: f32[64,16], index: 7, kind: output, shape index: {}]  }
   0x1   :  { %v1694_v0 = vld [vmem:[%s2825_s0 + $0x20] sm:$0xff]  ;;  %v1699_v1 = vld [vmem:[%s2825_s0 + $0x28] sm:$0xff]  ;;  %v1713_v7 = vld [vmem:[%s2825_s0 + $0x30] sm:$0xff] }
   0x2   :  { %v54_v2 = vsel %vm41_vm0, %v1694_v0, 0.0  ;;  %v79_v3 = vmul.f32 %v1694_v0, %v1694_v0  ;;  %v80_v4 = vmul.f32 %v1699_v1, %v1699_v1  ;;  %v57_v6 = vsel %vm41_vm0, %v1699_v1, 0.0  ;;  %v1719_v9 = vld [vmem:[%s2825_s0 + $0x38] sm:$0xff]  ;;  %v1733_v15 = vld [vmem:[%s2825_s0] sm:$0xff]  ;;  %v1739_v17 = vld [vmem:[%s2825_s0 + $0x8] sm:$0xff] }
   0x3   :  { %55 = vadd.xlane.f32.xlu0 %v54_v2  ;;  %v60_v10 = vsel %vm41_vm0, %v1713_v7, 0.0  ;;  %v81_v11 = vmul.f32 %v1713_v7, %v1713_v7  ;;  %v63_v12 = vsel %vm41_vm0, %v1719_v9, 0.0  ;;  %v82_v13 = vmul.f32 %v1719_v9, %v1719_v9  ;;  %v1753_v23 = vld [vmem:[%s2825_s0 + $0x10] sm:$0xff]  ;;  %v1759_v25 = vld [vmem:[%s2825_s0 + $0x18] sm:$0xff]  ;;  %v187_v32 = vld [vmem:[%s2826_s1] sm:$0xff] }
   0x4   :  { %v95_v5 = vsel %vm41_vm0, %v79_v3, 0.0  ;;  %v98_v8 = vsel %vm41_vm0, %v80_v4, 0.0  ;;  %v42_v18 = vsel %vm41_vm0, %v1733_v15, 0.0  ;;  %v75_v19 = vmul.f32 %v1733_v15, %v1733_v15  ;;  %v188_v33 = vld [vmem:[%s2826_s1 + $0x8] sm:$0xff]  ;;  %v189_v35 = vld [vmem:[%s2826_s1 + $0x10] sm:$0xff]  ;;  %v190_v36 = vld [vmem:[%s2826_s1 + $0x18] sm:$0xff] }
   0x5   :  { %96 = vadd.xlane.f32.xlu1 %v95_v5  ;;  %v101_v14 = vsel %vm41_vm0, %v81_v11, 0.0  ;;  %v104_v16 = vsel %vm41_vm0, %v82_v13, 0.0  ;;  %v45_v20 = vsel %vm41_vm0, %v1739_v17, 0.0  ;;  %v76_v21 = vmul.f32 %v1739_v17, %v1739_v17 }
   0x6   :  { %v83_v22 = vsel %vm41_vm0, %v75_v19, 0.0  ;;  %v48_v26 = vsel %vm41_vm0, %v1753_v23, 0.0  ;;  %v77_v27 = vmul.f32 %v1753_v23, %v1753_v23  ;;  %v51_v28 = vsel %vm41_vm0, %v1759_v25, 0.0 }
   0x7   :  { %58 = vadd.xlane.f32.xlu0 %v57_v6  ;;  %v86_v24 = vsel %vm41_vm0, %v76_v21, 0.0  ;;  %v78_v29 = vmul.f32 %v1759_v25, %v1759_v25  ;;  %v1577_v34 = vpack.c.bf16 %v188_v33, %v187_v32  ;;  %v1581_v37 = vpack.c.bf16 %v190_v36, %v189_v35 }
   0x8   :  { %v89_v30 = vsel %vm41_vm0, %v77_v27, 0.0 }
   0x9   :  { %99 = vadd.xlane.f32.xlu1 %v98_v8  ;;  %v92_v31 = vsel %vm41_vm0, %v78_v29, 0.0  ;;  %1601 = vmatprep.subr.bf16.mxu1 %v1577_v34 }
   0xa   :  { %1578 = vmatprep.subr.bf16.mxu0 %v1577_v34  ;;  %1603 = vmatpush3.bf16.msra.mxu1 %v1577_v34 }
   0xb   :  { %61 = vadd.xlane.f32.xlu0 %v60_v10  ;;  %1580 = vmatpush3.bf16.msra.mxu0 %v1577_v34 }
   0xc   :  { %1602 = vmatprep.subr.bf16.mxu1 %v1581_v37  ;;  %1582 = vmatprep.subr.bf16.mxu0 %v1581_v37 }
   0xd   :  { %64 = vadd.xlane.f32.xlu1 %v63_v12  ;;  %v1791_v12 = vld [vmem:[%s2827_s6] ss:$0 sm:$0xff] }
   0xe   :  { %1604 = vmatpush3.bf16.msra.mxu1 %v1581_v37 }
   0xf   :  { %102 = vadd.xlane.f32.xlu0 %v101_v14  ;;  %1584 = vmatpush3.bf16.msra.mxu0 %v1581_v37 }
  0x11   :  { %105 = vadd.xlane.f32.xlu1 %v104_v16 }
  0x13   :  { %43 = vadd.xlane.f32.xlu0 %v42_v18 }
  0x15   :  { %46 = vadd.xlane.f32.xlu1 %v45_v20 }
  0x17   :  { %84 = vadd.xlane.f32.xlu0 %v83_v22 }
  0x19   :  { %87 = vadd.xlane.f32.xlu1 %v86_v24 }
  0x1b   :  { %49 = vadd.xlane.f32.xlu0 %v48_v26 }
  0x1d   :  { %52 = vadd.xlane.f32.xlu1 %v51_v28 }
  0x1f   :  { %90 = vadd.xlane.f32.xlu0 %v89_v30 }
  0x21   :  { %93 = vadd.xlane.f32.xlu1 %v92_v31 }
  0x90   :  { %v56_v38 = vpop.xlane.xlu0 %55 }
  0x91   :  { %v71_v39 = vmul.f32 0.03125, %v56_v38 }
  0x92   :  { %v97_v40 = vpop.xlane.xlu1 %96 }
  0x93   :  { %v119_v41 = vmul.f32 %v71_v39, %v71_v39  ;;  %v111_v42 = vmul.f32 0.03125, %v97_v40  ;;  %v135_v5 = vsub.f32 %v1694_v0, %v71_v39  ;;  %v1796_v0 = vld [vmem:[%s2827_s6 + $0x1] ss:$0 sm:$0xff] }
  0x94   :  { %v59_v43 = vpop.xlane.xlu0 %58 }
  0x95   :  { %v127_v44 = vsub.f32 %v111_v42, %v119_v41  ;;  %v72_v45 = vmul.f32 0.03125, %v59_v43 }
  0x96   :  { %v100_v46 = vpop.xlane.xlu1 %99 }
  0x97   :  { %v143_v47 = vadd.f32 1e-05, %v127_v44  ;;  %v120_v48 = vmul.f32 %v72_v45, %v72_v45  ;;  %v112_v49 = vmul.f32 0.03125, %v100_v46  ;;  %v136_v19 = vsub.f32 %v1699_v1, %v72_v45 }
  0x98   :  { %v62_v50 = vpop.xlane.xlu0 %61 }
  0x99   :  { %1608 = vrsqrt.f32 %v143_v47  ;;  %v128_v51 = vsub.f32 %v112_v49, %v120_v48  ;;  %v73_v52 = vmul.f32 0.03125, %v62_v50 }
  0x9a   :  { %v65_v53 = vpop.xlane.xlu1 %64 }
  0x9b   :  { %v144_v54 = vadd.f32 1e-05, %v128_v51  ;;  %v121_v55 = vmul.f32 %v73_v52, %v73_v52  ;;  %v74_v56 = vmul.f32 0.03125, %v65_v53  ;;  %v137_v37 = vsub.f32 %v1713_v7, %v73_v52 }
  0x9c   :  { %v103_v57 = vpop.xlane.xlu0 %102 }
  0x9d   :  { %1610 = vrsqrt.f32 %v144_v54  ;;  %v122_v58 = vmul.f32 %v74_v56, %v74_v56  ;;  %v113_v59 = vmul.f32 0.03125, %v103_v57  ;;  %v138_v43 = vsub.f32 %v1719_v9, %v74_v56 }
  0x9e   :  { %v106_v60 = vpop.xlane.xlu1 %105 }
  0x9f   :  { %v129_v61 = vsub.f32 %v113_v59, %v121_v55  ;;  %v114_v62 = vmul.f32 0.03125, %v106_v60 }
  0xa0   :  { %v44_v63 = vpop.xlane.xlu0 %43 }
  0xa1   :  { %v145_v2 = vadd.f32 1e-05, %v129_v61  ;;  %v130_v3 = vsub.f32 %v114_v62, %v122_v58  ;;  %v1783_v4 = vmul.f32 0.03125, %v44_v63 }
  0xa2   :  { %v47_v6 = vpop.xlane.xlu1 %46 }
  0xa3   :  { %v1609_v8 = vpop.eup %1608  ;;  %1612 = vrsqrt.f32 %v145_v2  ;;  %v146_v10 = vadd.f32 1e-05, %v130_v3  ;;  %v115_v11 = vmul.f32 %v1783_v4, %v1783_v4  ;;  %v68_v13 = vmul.f32 0.03125, %v47_v6 }
  0xa4   :  { %v85_v14 = vpop.xlane.xlu0 %84  ;;  %v159_v16 = vmul.f32 %v1609_v8, %v135_v5  ;;  %v131_v53 = vsub.f32 %v1733_v15, %v1783_v4 }
  0xa5   :  { %1614 = vrsqrt.f32 %v146_v10  ;;  %v107_v18 = vmul.f32 0.03125, %v85_v14  ;;  %v116_v20 = vmul.f32 %v68_v13, %v68_v13  ;;  %v132_v56 = vsub.f32 %v1739_v17, %v68_v13  ;;  %v1833_v14 = vld [vmem:[%s2827_s6 + $0x6] ss:$0 sm:$0xff] }
  0xa6   :  { %v88_v21 = vpop.xlane.xlu1 %87  ;;  %v171_v22 = vmul.f32 %v1791_v12, %v159_v16  ;;  %v337_v13 = vlaneseq }
  0xa7   :  { %v1611_v24 = vpop.eup %1610  ;;  %v123_v26 = vsub.f32 %v107_v18, %v115_v11  ;;  %v108_v27 = vmul.f32 0.03125, %v88_v21 }
  0xa8   :  { %v50_v28 = vpop.xlane.xlu0 %49  ;;  %v183_v29 = vadd.f32 %v1796_v0, %v171_v22  ;;  %v160_v30 = vmul.f32 %v1611_v24, %v136_v19  ;;  %v1835_v16 = vshrl.u32 %v337_v13, 7 }
  0xa9   :  { %v139_v31 = vadd.f32 1e-05, %v123_v26  ;;  %v124_v32 = vsub.f32 %v108_v27, %v116_v20  ;;  %v69_v33 = vmul.f32 0.03125, %v50_v28  ;;  %v1849_v27 = vld [vmem:[%s2828_s2 + $0x1] ss:$0 sm:$0xff] }
  0xaa   :  { %1531 = vmatprep.mubr.msk.f32.mxu1 %vm41_vm0, %v183_v29  ;;  %v53_v34 = vpop.xlane.xlu1 %52  ;;  %v172_v35 = vmul.f32 %v1791_v12, %v160_v30  ;;  %vm339_vm1 = vcmp.lt.s32.totalorder %v1835_v16, 1  ;;  %vm361_vm2 = vcmp.lt.s32.totalorder %v1835_v16, 2  ;;  %v1857_v30 = vld [vmem:[%s2828_s2 + $0x2] ss:$0 sm:$0xff]  ;;  %vm530_vm3 = vcmp.lt.s32.totalorder %v1835_v16, 3 }
  0xab   :  { %1616 = vrsqrt.f32 %v139_v31  ;;  %v140_v1 = vadd.f32 1e-05, %v124_v32  ;;  %v117_v36 = vmul.f32 %v69_v33, %v69_v33  ;;  %v70_v38 = vmul.f32 0.03125, %v53_v34 }
  0xac   :  { %v91_v39 = vpop.xlane.xlu0 %90  ;;  %v184_v40 = vadd.f32 %v1796_v0, %v172_v35  ;;  %v133_v62 = vsub.f32 %v1753_v23, %v69_v33  ;;  %vm552_vm4 = vcmp.lt.s32.totalorder %v1835_v16, 4  ;;  %vm574_vm5 = vcmp.lt.s32.totalorder %v1835_v16, 5 }
  0xad   :  { %v1613_v41 = vpop.eup %1612  ;;  %1618 = vrsqrt.f32 %v140_v1  ;;  %v109_v42 = vmul.f32 0.03125, %v91_v39  ;;  %v118_v44 = vmul.f32 %v70_v38, %v70_v38  ;;  %v134_v17 = vsub.f32 %v1759_v25, %v70_v38 }
  0xae   :  { %1532 = vmatmul.mubr.msk.f32.vlgmr.msra.gmra.mrb[0].mxu1 %vm41_vm0, %v184_v40  ;;  %v94_v45 = vpop.xlane.xlu1 %93  ;;  %v161_v46 = vmul.f32 %v1613_v41, %v137_v37  ;;  %vm596_vm6 = vcmp.lt.s32.totalorder %v1835_v16, 6  ;;  %vm618_vm7 = vcmp.lt.s32.totalorder %v1835_v16, 7 }
  0xaf   :  { %v1615_v47 = vpop.eup %1614  ;;  %v125_v48 = vsub.f32 %v109_v42, %v117_v36  ;;  %v110_v49 = vmul.f32 0.03125, %v94_v45 }
  0xb0   :  { %v173_v50 = vmul.f32 %v1791_v12, %v161_v46  ;;  %v162_v7 = vmul.f32 %v1615_v47, %v138_v43 }
  0xb1   :  { %v141_v51 = vadd.f32 1e-05, %v125_v48  ;;  %v126_v52 = vsub.f32 %v110_v49, %v118_v44 }
  0xb2   :  { %v185_v54 = vadd.f32 %v1796_v0, %v173_v50  ;;  %v174_v9 = vmul.f32 %v1791_v12, %v162_v7 }
  0xb3   :  { %1620 = vrsqrt.f32 %v141_v51  ;;  %v142_v55 = vadd.f32 1e-05, %v126_v52 }
  0xb4   :  { %1534 = vmatprep.mubr.msk.f32.mxu1 %vm41_vm0, %v185_v54  ;;  %v186_v57 = vadd.f32 %v1796_v0, %v174_v9 }
  0xb5   :  { %v1617_v58 = vpop.eup %1616  ;;  %1622 = vrsqrt.f32 %v142_v55 }
  0xb6   :  { %1535 = vmatmul.mubr.msk.f32.gmra.mrb[2].mxu1 %vm41_vm0, %v186_v57  ;;  %v155_v59 = vmul.f32 %v1617_v58, %v131_v53 }
  0xb7   :  { %v1619_v60 = vpop.eup %1618 }
  0xb8   :  { %v167_v15 = vmul.f32 %v1791_v12, %v155_v59  ;;  %v156_v61 = vmul.f32 %v1619_v60, %v132_v56 }
  0xba   :  { %v179_v63 = vadd.f32 %v1796_v0, %v167_v15  ;;  %v168_v2 = vmul.f32 %v1791_v12, %v156_v61 }
  0xbc   :  { %1525 = vmatprep.mubr.msk.f32.mxu0 %vm41_vm0, %v179_v63  ;;  %v180_v3 = vadd.f32 %v1796_v0, %v168_v2 }
  0xbd   :  { %v1621_v4 = vpop.eup %1620 }
  0xbe   :  { %1526 = vmatmul.mubr.msk.f32.vlgmr.msra.gmra.mrb[0].mxu0 %vm41_vm0, %v180_v3  ;;  %v157_v5 = vmul.f32 %v1621_v4, %v133_v62 }
  0xbf   :  { %v1623_v6 = vpop.eup %1622 }
  0xc0   :  { %v169_v8 = vmul.f32 %v1791_v12, %v157_v5  ;;  %v158_v10 = vmul.f32 %v1623_v6, %v134_v17 }
  0xc2   :  { %v181_v23 = vadd.f32 %v1796_v0, %v169_v8  ;;  %v170_v11 = vmul.f32 %v1791_v12, %v158_v10 }
  0xc4   :  { %1528 = vmatprep.mubr.msk.f32.mxu0 %vm41_vm0, %v181_v23  ;;  %v182_v25 = vadd.f32 %v1796_v0, %v170_v11  ;;  %v1842_v0 = vld [vmem:[%s2828_s2] ss:$0 sm:$0xff]  ;;  %s1648_s2 = smov 64  }
  0xc6   :  { %1529 = vmatmul.mubr.msk.f32.gmra.mrb[2].mxu0 %vm41_vm0, %v182_v25 }
 0x181   :  { %v1533_v18 = vpop.f32.mrb[0].mxu1 }
 0x182   :  { %v311_v19 = vadd.f32 %v1533_v18, %v1833_v14  ;;  %v305_v20 = vpop.f32.mrb[1].mxu1 }
 0x183   :  { %v306_v12 = vadd.f32 %v1833_v14, %v305_v20 }
 0x184   :  { %v404_v21 = vrot.slane %v311_v19, 7  ;;  %v420_v22 = vrot.slane %v311_v19, 6  ;;  %v400_v28 = vmul.f32 %v1842_v0, %v311_v19 }
 0x185   :  { %v403_v24 = vrot.slane %v306_v12, 7  ;;  %v419_v26 = vrot.slane %v306_v12, 6  ;;  %v399_v33 = vmul.f32 %v1842_v0, %v306_v12 }
 0x187   :  { %v410_v29 = vsel %vm339_vm1, 0.0, %v403_v24  ;;  %v409_v31 = vsel %vm339_vm1, %v403_v24, %v404_v21  ;;  %v425_v32 = vsel %vm361_vm2, %v419_v26, %v420_v22  ;;  %v426_v1 = vsel %vm361_vm2, 0.0, %v419_v26 }
 0x188   :  { %v412_v34 = vmul.f32 %v1849_v27, %v409_v31  ;;  %v411_v35 = vmul.f32 %v1849_v27, %v410_v29  ;;  %v428_v40 = vmul.f32 %v1857_v30, %v425_v32  ;;  %v427_v43 = vmul.f32 %v1857_v30, %v426_v1 }
 0x189   :  { %v1536_v36 = vpop.f32.mrb[2].mxu1 }
 0x18a   :  { %v321_v37 = vadd.f32 %v1536_v36, %v1833_v14  ;;  %v315_v38 = vpop.f32.mrb[3].mxu1  ;;  %v416_v39 = vadd.f32 %v412_v34, %v400_v28  ;;  %v415_v41 = vadd.f32 %v411_v35, %v399_v33 }
 0x18b   :  { %v316_v42 = vadd.f32 %v1833_v14, %v315_v38 }
 0x18c   :  { %v406_v44 = vrot.slane %v321_v37, 7  ;;  %v422_v45 = vrot.slane %v321_v37, 6  ;;  %v1872_v46 = vadd.f32 %v428_v40, %v416_v39  ;;  %v1874_v49 = vadd.f32 %v427_v43, %v415_v41 }
 0x18d   :  { %v405_v47 = vrot.slane %v316_v42, 7  ;;  %v421_v48 = vrot.slane %v316_v42, 6  ;;  %v402_v53 = vmul.f32 %v1842_v0, %v321_v37  ;;  %v401_v54 = vmul.f32 %v1842_v0, %v316_v42 }
 0x18e   :  { %2901 = vst [vmem:[#allocation2_spill] sm:$0xff] %v1872_v46  ;;  %2902 = vst [vmem:[#allocation3_spill] sm:$0xff] %v1874_v49  ;;  %441 = vrot.lane.b32.xlu1 %v1872_v46, %s1648_s2  ;;  %439 = vrot.lane.b32.xlu0 %v1874_v49, %s1648_s2 }
 0x18f   :  { %v408_v50 = vsel %vm339_vm1, %v404_v21, %v405_v47  ;;  %v424_v7 = vsel %vm361_vm2, %v420_v22, %v421_v48  ;;  %v407_v51 = vsel %vm339_vm1, %v405_v47, %v406_v44  ;;  %v423_v52 = vsel %vm361_vm2, %v421_v48, %v422_v45 }
 0x190   :  { %v413_v9 = vmul.f32 %v1849_v27, %v408_v50  ;;  %v414_v55 = vmul.f32 %v1849_v27, %v407_v51  ;;  %v429_v60 = vmul.f32 %v1857_v30, %v424_v7  ;;  %v430_v62 = vmul.f32 %v1857_v30, %v423_v52 }
 0x191   :  { %v1527_v56 = vpop.f32.mrb[0].mxu0 }
 0x192   :  { %v291_v57 = vadd.f32 %v1527_v56, %v1833_v14  ;;  %v285_v58 = vpop.f32.mrb[1].mxu0  ;;  %v417_v59 = vadd.f32 %v413_v9, %v401_v54  ;;  %v418_v15 = vadd.f32 %v414_v55, %v402_v53  ;;  %v1961_v54 = vld [vmem:[%s2829_s3 + $0x10] ss:$0 sm:$0xff]  ;;  %v1966_v9 = vld [vmem:[%s2829_s3 + $0x11] ss:$0 sm:$0xff] }
 0x193   :  { %v286_v61 = vadd.f32 %v1833_v14, %v285_v58  ;;  %2909 = vst [vmem:[#allocation10_spill] sm:$0xff] %v1961_v54  ;;  %2910 = vst [vmem:[#allocation11_spill] sm:$0xff] %v1966_v9  ;;  %v1969_v56 = vmul.f32 0.0, %v1961_v54  ;;  %v1979_v58 = vld [vmem:[%s2829_s3 + $0x13] ss:$0 sm:$0xff] }
 0x194   :  { %v334_v63 = vrot.slane %v291_v57, 7  ;;  %v358_v2 = vrot.slane %v291_v57, 6  ;;  %v1896_v17 = vadd.f32 %v429_v60, %v417_v59  ;;  %v1898_v5 = vadd.f32 %v430_v62, %v418_v15  ;;  %2912 = vst [vmem:[#allocation13_spill] sm:$0xff] %v1979_v58  ;;  %v1995_v62 = vld [vmem:[%s2829_s3 + $0x15] ss:$0 sm:$0xff] }
 0x195   :  { %v333_v3 = vrot.slane %v286_v61, 7  ;;  %v357_v4 = vrot.slane %v286_v61, 6  ;;  %v330_v6 = vmul.f32 %v1842_v0, %v291_v57  ;;  %v329_v8 = vmul.f32 %v1842_v0, %v286_v61  ;;  %v1974_v57 = vld [vmem:[%s2829_s3 + $0x12] ss:$0 sm:$0xff]  ;;  %v1990_v61 = vld [vmem:[%s2829_s3 + $0x14] ss:$0 sm:$0xff] }
 0x196   :  { %2903 = vst [vmem:[#allocation4_spill] sm:$0xff] %v1896_v17  ;;  %2904 = vst [vmem:[#allocation5_spill] sm:$0xff] %v1898_v5  ;;  %443 = vrot.lane.b32.xlu1 %v1896_v17, %s1648_s2  ;;  %v1982_v60 = vmul.f32 0.0, %v1966_v9  ;;  %v1985_v15 = vmul.f32 0.0, %v1974_v57 }
 0x197   :  { %v343_v10 = vsel %vm339_vm1, 0.0, %v333_v3  ;;  %v342_v23 = vsel %vm339_vm1, %v333_v3, %v334_v63  ;;  %v364_v11 = vsel %vm361_vm2, %v357_v4, %v358_v2  ;;  %v365_v25 = vsel %vm361_vm2, 0.0, %v357_v4  ;;  %2911 = vst [vmem:[#allocation12_spill] sm:$0xff] %v1974_v57  ;;  %2913 = vst [vmem:[#allocation14_spill] sm:$0xff] %v1990_v61  ;;  %v2011_v4 = vld [vmem:[%s2829_s3 + $0x16] ss:$0 sm:$0xff] }
 0x198   :  { %v350_v13 = vmul.f32 %v1849_v27, %v342_v23  ;;  %v372_v18 = vmul.f32 %v1857_v30, %v364_v11  ;;  %v349_v19 = vmul.f32 %v1849_v27, %v343_v10  ;;  %v371_v12 = vmul.f32 %v1857_v30, %v365_v25  ;;  %2914 = vst [vmem:[#allocation15_spill] sm:$0xff] %v1995_v62  ;;  %v2032_v11 = vld [vmem:[%s2829_s3 + $0x19] ss:$0 sm:$0xff]  ;;  %v2037_v25 = vld [vmem:[%s2829_s3 + $0x1a] ss:$0 sm:$0xff] }
 0x199   :  { %v1530_v20 = vpop.f32.mrb[2].mxu0  ;;  %v2006_v3 = vmul.f32 0.0, %v1990_v61  ;;  %2916 = vst [vmem:[#allocation17_spill] sm:$0xff] %v2011_v4  ;;  %v2024_v10 = vmul.f32 0.0, %v1995_v62  ;;  %v2027_v23 = vmul.f32 0.0, %v2011_v4  ;;  %2918 = vst [vmem:[#allocation19_spill] sm:$0xff] %v2032_v11 }
 0x19a   :  { %v301_v21 = vadd.f32 %v1530_v20, %v1833_v14  ;;  %445 = vrot.lane.b32.xlu1 %v1898_v5, %s1648_s2  ;;  %v295_v22 = vpop.f32.mrb[3].mxu0  ;;  %v354_v24 = vadd.f32 %v350_v13, %v330_v6  ;;  %v353_v26 = vadd.f32 %v349_v19, %v329_v8  ;;  %v2016_v6 = vld [vmem:[%s2829_s3 + $0x17] ss:$0 sm:$0xff]  ;;  %v2021_v8 = vld [vmem:[%s2829_s3 + $0x8] ss:$0 sm:$0xff]  ;;  %2919 = vst [vmem:[#allocation20_spill] sm:$0xff] %v2037_v25 }
 0x19b   :  { %v296_v28 = vadd.f32 %v1833_v14, %v295_v22  ;;  %2917 = vst [vmem:[#allocation18_spill] sm:$0xff] %v2016_v6  ;;  %v2048_v19 = vld [vmem:[%s2829_s3 + $0xa] ss:$0 sm:$0xff]  ;;  %v2051_v20 = vmul.f32 0.0, %v2016_v6  ;;  %v2064_v22 = vld [vmem:[%s2829_s3 + $0x1c] ss:$0 sm:$0xff] }
 0x19c   :  { %v336_v29 = vrot.slane %v301_v21, 7  ;;  %v360_v31 = vrot.slane %v301_v21, 6  ;;  %v1920_v32 = vadd.f32 %v372_v18, %v354_v24  ;;  %v1922_v35 = vadd.f32 %v371_v12, %v353_v26  ;;  %v2043_v18 = vld [vmem:[%s2829_s3 + $0x9] ss:$0 sm:$0xff]  ;;  %2921 = vst [vmem:[#allocation22_spill] sm:$0xff] %v2064_v22 }
 0x19d   :  { %v335_v33 = vrot.slane %v296_v28, 7  ;;  %v359_v34 = vrot.slane %v296_v28, 6  ;;  %v332_v1 = vmul.f32 %v1842_v0, %v301_v21  ;;  %v331_v36 = vmul.f32 %v1842_v0, %v296_v28  ;;  %v2059_v21 = vld [vmem:[%s2829_s3 + $0x1b] ss:$0 sm:$0xff] }
 0x19e   :  { %2905 = vst [vmem:[#allocation6_spill] sm:$0xff] %v1920_v32  ;;  %2906 = vst [vmem:[#allocation7_spill] sm:$0xff] %v1922_v35  ;;  %385 = vrot.lane.b32.xlu1 %v1920_v32, %s1648_s2  ;;  %383 = vrot.lane.b32.xlu0 %v1922_v35, %s1648_s2 }
 0x19f   :  { %v340_v14 = vsel %vm339_vm1, %v335_v33, %v336_v29  ;;  %v362_v37 = vsel %vm361_vm2, %v359_v34, %v360_v31  ;;  %v341_v38 = vsel %vm339_vm1, %v334_v63, %v335_v33  ;;  %v363_v39 = vsel %vm361_vm2, %v358_v2, %v359_v34  ;;  %v2000_v63 = vld [vmem:[%s2829_s3 + $0x18] ss:$0 sm:$0xff]  ;;  %2920 = vst [vmem:[#allocation21_spill] sm:$0xff] %v2059_v21  ;;  %v2073_v29 = vld [vmem:[%s2829_s3 + $0xb] ss:$0 sm:$0xff] }
 0x1a0   :  { %v352_v0 = vmul.f32 %v1849_v27, %v340_v14  ;;  %v374_v40 = vmul.f32 %v1857_v30, %v362_v37  ;;  %v351_v41 = vmul.f32 %v1849_v27, %v341_v38  ;;  %v373_v42 = vmul.f32 %v1857_v30, %v363_v39  ;;  %2915 = vst [vmem:[#allocation16_spill] sm:$0xff] %v2000_v63  ;;  %v2078_v31 = vld [vmem:[%s2829_s3 + $0xc] ss:$0 sm:$0xff]  ;;  %v2083_v33 = vld [vmem:[%s2829_s3 + $0xd] ss:$0 sm:$0xff] }
 0x1a1   :  { %v2003_v2 = vmul.f32 0.0, %v1979_v58  ;;  %v2054_v12 = vmul.f32 0.0, %v2000_v63  ;;  %2922 = vst [vmem:[#allocation23_spill] sm:$0xff] %v2083_v33  ;;  %v2086_v34 = vmul.f32 0.0, %v2032_v11  ;;  %v2099_v14 = vld [vmem:[%s2829_s3 + $0x1e] ss:$0 sm:$0xff] }
 0x1a2   :  { %v356_v43 = vadd.f32 %v352_v0, %v332_v1  ;;  %v355_v44 = vadd.f32 %v351_v41, %v331_v36  ;;  %v2089_v1 = vmul.f32 0.0, %v2037_v25  ;;  %v2094_v36 = vld [vmem:[%s2829_s3 + $0x1d] ss:$0 sm:$0xff]  ;;  %2924 = vst [vmem:[#allocation25_spill] sm:$0xff] %v2099_v14  ;;  %v2104_v37 = vld [vmem:[%s2829_s3] ss:$0 sm:$0xff] }
 0x1a3   :  { %2923 = vst [vmem:[#allocation24_spill] sm:$0xff] %v2094_v36  ;;  %v2107_v38 = vmul.f32 0.0, %v2059_v21  ;;  %v2110_v39 = vmul.f32 0.0, %v2064_v22  ;;  %v2113_v0 = vmul.f32 0.0, %v2094_v36  ;;  %v2121_v41 = vmul.f32 0.0, %v2021_v8 }
 0x1a4   :  { %v1942_v45 = vadd.f32 %v374_v40, %v356_v43  ;;  %v1944_v47 = vadd.f32 %v373_v42, %v355_v44  ;;  %v2118_v40 = vld [vmem:[%s2829_s3 + $0x1f] ss:$0 sm:$0xff]  ;;  %v2126_v42 = vld [vmem:[%s2829_s3 + $0xe] ss:$0 sm:$0xff]  ;;  %v2129_v43 = vmul.f32 0.0, %v2099_v14 }
 0x1a5   :  { %2925 = vst [vmem:[#allocation26_spill] sm:$0xff] %v2110_v39  ;;  %2926 = vst [vmem:[#allocation27_spill] sm:$0xff] %v2113_v0  ;;  %v2132_v44 = vmul.f32 0.0, %v2118_v40  ;;  %v2204_v36 = vld [vmem:[%s2829_s3 + $0x4] ss:$0 sm:$0xff] }
 0x1a6   :  { %2907 = vst [vmem:[#allocation8_spill] sm:$0xff] %v1942_v45  ;;  %2908 = vst [vmem:[#allocation9_spill] sm:$0xff] %v1944_v47  ;;  %389 = vrot.lane.b32.xlu1 %v1942_v45, %s1648_s2  ;;  %387 = vrot.lane.b32.xlu0 %v1944_v47, %s1648_s2  ;;  %v2209_v22 = vld [vmem:[%s2829_s3 + $0x5] ss:$0 sm:$0xff]  ;;  %s1650_s2 = smov 96  }
 0x1a7   :  { %2927 = vst [vmem:[#allocation28_spill] sm:$0xff] %v2118_v40  ;;  %2928 = vst [vmem:[#allocation29_spill] sm:$0xff] %v2129_v43 }
 0x1a8   :  { %2929 = vst [vmem:[#allocation30_spill] sm:$0xff] %v2132_v44 }
 0x200   :  { %v442_v48 = vpop.permute.xlu1 %441  ;;  %v440_v7 = vpop.permute.xlu0 %439 }
 0x201   :  { %v452_v50 = vmul.f32 %v442_v48, %v1872_v46  ;;  %v451_v27 = vmul.f32 %v440_v7, %v1874_v49  ;;  %v2135_v48 = vmul.f32 0.0, %v2043_v18 }
 0x203   :  { %461 = vrot.lane.b32.xlu1 %v452_v50, %s1649_s13  ;;  %459 = vrot.lane.b32.xlu0 %v451_v27, %s1649_s13  ;;  %v2138_v50 = vmul.f32 0.0, %v2048_v19  ;;  %v2143_v27 = vld [vmem:[%s2829_s3 + $0xf] ss:$0 sm:$0xff] }
 0x208   :  { %v444_v30 = vpop.permute.xlu1 %443 }
 0x209   :  { %v453_v51 = vmul.f32 %v444_v30, %v1896_v17  ;;  %v2146_v30 = vmul.f32 0.0, %v2073_v29  ;;  %v2165_v17 = vmul.f32 0.0, %v2143_v27 }
 0x20b   :  { %463 = vrot.lane.b32.xlu0 %v453_v51, %s1649_s13  ;;  %v2149_v51 = vmul.f32 0.0, %v2078_v31  ;;  %2934 = vst [vmem:[#allocation35_spill] sm:$0xff] %v2165_v17 }
 0x20c   :  { %v446_v52 = vpop.permute.xlu1 %445 }
 0x20d   :  { %v454_v53 = vmul.f32 %v446_v52, %v1898_v5  ;;  %2930 = vst [vmem:[#allocation31_spill] sm:$0xff] %v2149_v51  ;;  %v2152_v52 = vmul.f32 0.0, %v2083_v33 }
 0x20f   :  { %465 = vrot.lane.b32.xlu1 %v454_v53, %s1649_s13  ;;  %2931 = vst [vmem:[#allocation32_spill] sm:$0xff] %v2152_v52  ;;  %v2155_v53 = vmul.f32 0.0, %v2126_v42 }
 0x210   :  { %v386_v55 = vpop.permute.xlu1 %385  ;;  %v384_v59 = vpop.permute.xlu0 %383 }
 0x211   :  { %v396_v24 = vmul.f32 %v386_v55, %v1920_v32  ;;  %v395_v26 = vmul.f32 %v384_v59, %v1922_v35  ;;  %2932 = vst [vmem:[#allocation33_spill] sm:$0xff] %v2155_v53 }
 0x218   :  { %v390_v13 = vpop.permute.xlu1 %389  ;;  %v388_v28 = vpop.permute.xlu0 %387 }
 0x219   :  { %v398_v55 = vmul.f32 %v390_v13, %v1942_v45  ;;  %v397_v59 = vmul.f32 %v388_v28, %v1944_v47  ;;  %v2188_v28 = vld [vmem:[%s2829_s3 + $0x2] ss:$0 sm:$0xff]  ;;  %v2195_v13 = vld [vmem:[%s2829_s3 + $0x3] ss:$0 sm:$0xff] }
 0x275   :  { %v462_v7 = vpop.permute.xlu1 %461  ;;  %v460_v46 = vpop.permute.xlu0 %459 }
 0x276   :  { %v2160_v5 = vsel %vm41_vm0, %v396_v24, %v462_v7  ;;  %v2173_v24 = vsel %vm41_vm0, %v395_v26, %v460_v46  ;;  %v2178_v7 = vld [vmem:[%s2829_s3 + $0x1] ss:$0 sm:$0xff] }
 0x277   :  { %2933 = vst [vmem:[#allocation34_spill] sm:$0xff] %v2160_v5  ;;  %2935 = vst [vmem:[#allocation36_spill] sm:$0xff] %v2173_v24  ;;  %v481_v45 = vmul.f32 %v2104_v37, %v2160_v5  ;;  %v484_v35 = vrot.slane %v2173_v24, 7  ;;  %v505_v32 = vrot.slane %v2173_v24, 6  ;;  %v526_v46 = vrot.slane %v2173_v24, 5 }
 0x278   :  { %v548_v26 = vrot.slane %v2173_v24, 4  ;;  %v570_v49 = vrot.slane %v2173_v24, 3  ;;  %v592_v47 = vrot.slane %v2173_v24, 2  ;;  %v614_v40 = vrot.slane %v2173_v24, 1 }
 0x279   :  { %v2936_v21 = vrot.slane %v2160_v5, 7  ;;  %v2219_v11 = vsel %vm339_vm1, 0.0, %v484_v35  ;;  %v2939_v14 = vrot.slane %v2160_v5, 6  ;;  %v2229_v6 = vsel %vm361_vm2, 0.0, %v505_v32 }
 0x27a   :  { %2938 = vst [vmem:[#allocation38_spill] sm:$0xff] %v2219_v11  ;;  %2941 = vst [vmem:[#allocation40_spill] sm:$0xff] %v2229_v6  ;;  %v2942_v62 = vrot.slane %v2160_v5, 5  ;;  %v2945_v58 = vrot.slane %v2160_v5, 4  ;;  %v2255_v9 = vsel %vm552_vm4, 0.0, %v548_v26  ;;  %v2953_v53 = vrot.slane %v2160_v5, 1 }
 0x27b   :  { %v2215_v25 = vsel %vm339_vm1, %v484_v35, %v2936_v21  ;;  %v2225_v63 = vsel %vm361_vm2, %v505_v32, %v2939_v14  ;;  %v2243_v14 = vsel %vm530_vm3, 0.0, %v526_v46  ;;  %2947 = vst [vmem:[#allocation44_spill] sm:$0xff] %v2255_v9 }
 0x27c   :  { %2937 = vst [vmem:[#allocation37_spill] sm:$0xff] %v2215_v25  ;;  %2940 = vst [vmem:[#allocation39_spill] sm:$0xff] %v2225_v63  ;;  %v498_v4 = vmul.f32 %v2178_v7, %v2215_v25  ;;  %v519_v21 = vmul.f32 %v2188_v28, %v2225_v63  ;;  %v2239_v35 = vsel %vm530_vm3, %v526_v46, %v2942_v62  ;;  %v2948_v62 = vrot.slane %v2160_v5, 3  ;;  %v2277_v63 = vld [vmem:[%s2829_s3 + $0x6] ss:$0 sm:$0xff] }
 0x27d   :  { %2943 = vst [vmem:[#allocation41_spill] sm:$0xff] %v2239_v35  ;;  %2944 = vst [vmem:[#allocation42_spill] sm:$0xff] %v2243_v14  ;;  %v464_v61 = vpop.permute.xlu0 %463  ;;  %v541_v32 = vmul.f32 %v2195_v13, %v2239_v35  ;;  %v2251_v57 = vsel %vm552_vm4, %v548_v26, %v2945_v58  ;;  %v2270_v58 = vsel %vm574_vm5, 0.0, %v570_v49  ;;  %v2305_v25 = vsel %vm618_vm7, %v614_v40, %v2953_v53 }
 0x27e   :  { %2946 = vst [vmem:[#allocation43_spill] sm:$0xff] %v2251_v57  ;;  %v2261_v46 = vsel %vm574_vm5, %v570_v49, %v2948_v62  ;;  %v2264_v54 = vsel %vm41_vm0, %v397_v59, %v464_v61  ;;  %v563_v35 = vmul.f32 %v2204_v36, %v2251_v57  ;;  %v2286_v49 = vld [vmem:[%s2829_s3 + $0x7] ss:$0 sm:$0xff]  ;;  %v2950_v61 = vrot.slane %v2160_v5, 2  ;;  %2954 = vst [vmem:[#allocation48_spill] sm:$0xff] %v2305_v25 }
 0x27f   :  { %2949 = vst [vmem:[#allocation45_spill] sm:$0xff] %v2261_v46  ;;  %v585_v26 = vmul.f32 %v2209_v22, %v2261_v46  ;;  %v2299_v57 = vsel %vm596_vm6, 0.0, %v592_v47  ;;  %v2958_v5 = vrot.slane %v2264_v54, 6  ;;  %v2961_v51 = vrot.slane %v2264_v54, 4 }
 0x280   :  { %v567_v44 = vadd.f32 %v563_v35, %v481_v45  ;;  %v2295_v59 = vsel %vm596_vm6, %v592_v47, %v2950_v61  ;;  %2952 = vst [vmem:[#allocation47_spill] sm:$0xff] %v2299_v57  ;;  %v2314_v35 = vsel %vm618_vm7, 0.0, %v614_v40  ;;  %v629_v47 = vmul.f32 %v2286_v49, %v2305_v25 }
 0x281   :  { %v466_v43 = vpop.permute.xlu1 %465  ;;  %v589_v62 = vadd.f32 %v585_v26, %v498_v4  ;;  %2951 = vst [vmem:[#allocation46_spill] sm:$0xff] %v2295_v59  ;;  %v607_v4 = vmul.f32 %v2277_v63, %v2295_v59  ;;  %2956 = vst [vmem:[#allocation50_spill] sm:$0xff] %v2314_v35  ;;  %v2957_v59 = vrot.slane %v2264_v54, 7 }
 0x282   :  { %v2308_v45 = vsel %vm41_vm0, %v398_v55, %v466_v43  ;;  %v633_v0 = vadd.f32 %v629_v47, %v541_v32  ;;  %v642_v32 = vmul.f32 %v2021_v8, %v2173_v24 }
 0x283   :  { %2955 = vst [vmem:[#allocation49_spill] sm:$0xff] %v2308_v45  ;;  %v483_v26 = vmul.f32 %v2104_v37, %v2308_v45  ;;  %v487_v61 = vrot.slane %v2308_v45, 7  ;;  %v508_v53 = vrot.slane %v2308_v45, 6  ;;  %v551_v55 = vrot.slane %v2308_v45, 4 }
 0x284   :  { %v573_v17 = vrot.slane %v2308_v45, 3  ;;  %v595_v46 = vrot.slane %v2308_v45, 2  ;;  %v611_v43 = vadd.f32 %v607_v4, %v519_v21  ;;  %v2962_v45 = vrot.slane %v2264_v54, 3 }
 0x285   :  { %v488_v25 = vsel %vm339_vm1, %v2957_v59, %v487_v61  ;;  %v2335_v52 = vsel %vm361_vm2, %v2958_v5, %v508_v53  ;;  %v553_v40 = vsel %vm552_vm4, %v2961_v51, %v551_v55  ;;  %v2963_v61 = vrot.slane %v2264_v54, 2 }
 0x286   :  { %2959 = vst [vmem:[#allocation51_spill] sm:$0xff] %v2335_v52  ;;  %v2338_v39 = vmul.f32 %v2178_v7, %v488_v25  ;;  %v575_v59 = vsel %vm574_vm5, %v2962_v45, %v573_v17  ;;  %v565_v21 = vmul.f32 %v2204_v36, %v553_v40  ;;  %v655_v51 = vmul.f32 %v2043_v18, %v2219_v11 }
 0x287   :  { %v2352_v5 = vsel %vm596_vm6, %v2963_v61, %v595_v46  ;;  %v2356_v25 = vmul.f32 %v2209_v22, %v575_v59  ;;  %v668_v17 = vmul.f32 %v2048_v19, %v2229_v6  ;;  %v681_v45 = vmul.f32 %v2073_v29, %v2243_v14 }
 0x288   :  { %2960 = vst [vmem:[#allocation52_spill] sm:$0xff] %v2338_v39  ;;  %2964 = vst [vmem:[#allocation53_spill] sm:$0xff] %v2352_v5  ;;  %v694_v46 = vmul.f32 %v2078_v31, %v2255_v9  ;;  %v707_v4 = vmul.f32 %v2083_v33, %v2270_v58  ;;  %v2370_v47 = vadd.f32 %v565_v21, %v483_v26 }
 0x289   :  { %2965 = vst [vmem:[#allocation54_spill] sm:$0xff] %v2356_v25  ;;  %v646_v53 = vadd.f32 %v642_v32, %v567_v44  ;;  %v659_v55 = vadd.f32 %v655_v51, %v589_v62  ;;  %v720_v40 = vmul.f32 %v2126_v42, %v2299_v57  ;;  %v672_v59 = vadd.f32 %v668_v17, %v611_v43 }
 0x28a   :  { %2966 = vst [vmem:[#allocation55_spill] sm:$0xff] %v2370_v47  ;;  %v685_v61 = vadd.f32 %v681_v45, %v633_v0  ;;  %v733_v5 = vmul.f32 %v2143_v27, %v2314_v35  ;;  %v480_v25 = vmul.f32 %v2104_v37, %v2173_v24  ;;  %v497_v33 = vmul.f32 %v2178_v7, %v2219_v11 }
 0x28b   :  { %v698_v39 = vadd.f32 %v694_v46, %v646_v53  ;;  %v711_v52 = vadd.f32 %v707_v4, %v659_v55  ;;  %v518_v44 = vmul.f32 %v2188_v28, %v2229_v6  ;;  %v724_v62 = vadd.f32 %v720_v40, %v672_v59 }
 0x28c   :  { %v737_v26 = vadd.f32 %v733_v5, %v685_v61  ;;  %v540_v43 = vmul.f32 %v2195_v13, %v2243_v14  ;;  %v562_v0 = vmul.f32 %v2204_v36, %v2255_v9  ;;  %v584_v51 = vmul.f32 %v2209_v22, %v2270_v58 }
 0x28d   :  { %v749_v21 = vadd.f32 %v1969_v56, %v698_v39  ;;  %v761_v32 = vadd.f32 %v1982_v60, %v711_v52  ;;  %v606_v17 = vmul.f32 %v2277_v63, %v2299_v57  ;;  %v773_v45 = vadd.f32 %v1985_v15, %v724_v62 }
 0x28e   :  { %v785_v5 = vadd.f32 %v2003_v2, %v737_v26  ;;  %v566_v46 = vadd.f32 %v562_v0, %v480_v25  ;;  %v628_v4 = vmul.f32 %v2286_v49, %v2314_v35  ;;  %v588_v55 = vadd.f32 %v584_v51, %v497_v33 }
 0x28f   :  { %v797_v53 = vadd.f32 %v2006_v3, %v749_v21  ;;  %v809_v39 = vadd.f32 %v2024_v10, %v761_v32  ;;  %v610_v52 = vadd.f32 %v606_v17, %v518_v44  ;;  %v821_v40 = vadd.f32 %v2027_v23, %v773_v45  ;;  %v2967_v32 = vld [vmem:[#allocation31_spill] sm:$0xff]  ;;  %v2968_v17 = vld [vmem:[#allocation26_spill] sm:$0xff] }
 0x290   :  { %v833_v59 = vadd.f32 %v2051_v20, %v785_v5  ;;  %v632_v61 = vadd.f32 %v628_v4, %v540_v43  ;;  %v645_v47 = vadd.f32 %v2121_v41, %v566_v46  ;;  %v658_v26 = vadd.f32 %v2135_v48, %v588_v55  ;;  %v2969_v45 = vld [vmem:[#allocation27_spill] sm:$0xff]  ;;  %v2970_v5 = vld [vmem:[#allocation32_spill] sm:$0xff]  ;;  %v2971_v4 = vld [vmem:[#allocation33_spill] sm:$0xff] }
 0x291   :  { %v844_v62 = vadd.f32 %v2054_v12, %v797_v53  ;;  %v855_v25 = vadd.f32 %v2086_v34, %v809_v39  ;;  %v671_v0 = vadd.f32 %v2138_v50, %v610_v52  ;;  %v866_v21 = vadd.f32 %v2089_v1, %v821_v40  ;;  %v2972_v39 = vld [vmem:[#allocation29_spill] sm:$0xff]  ;;  %v2973_v55 = vld [vmem:[#allocation30_spill] sm:$0xff]  ;;  %v2974_v52 = vld [vmem:[#allocation35_spill] sm:$0xff] }
 0x292   :  { %v877_v33 = vadd.f32 %v2107_v38, %v833_v59  ;;  %v684_v44 = vadd.f32 %v2146_v30, %v632_v61  ;;  %v697_v51 = vadd.f32 %v2967_v32, %v645_v47  ;;  %v710_v46 = vadd.f32 %v2970_v5, %v658_v26 }
 0x293   :  { %v888_v43 = vadd.f32 %v2968_v17, %v844_v62  ;;  %v899_v41 = vadd.f32 %v2969_v45, %v855_v25  ;;  %v723_v53 = vadd.f32 %v2971_v4, %v671_v0  ;;  %v910_v48 = vadd.f32 %v2972_v39, %v866_v21  ;;  %v2976_v0 = vld [vmem:[#allocation34_spill] sm:$0xff] }
 0x294   :  { %v921_v50 = vadd.f32 %v2973_v55, %v877_v33  ;;  %v736_v40 = vadd.f32 %v2974_v52, %v684_v44  ;;  %v748_v59 = vadd.f32 %v1969_v56, %v697_v51  ;;  %v760_v30 = vadd.f32 %v1982_v60, %v710_v46 }
 0x295   :  { %v925_v35 = vadd.f32 %v899_v41, %v888_v43  ;;  %v772_v47 = vadd.f32 %v1985_v15, %v723_v53  ;;  %v482_v61 = vmul.f32 %v2104_v37, %v2264_v54  ;;  %v2975_v26 = vrot.slane %v2264_v54, 7 }
 0x296   :  { %v784_v62 = vadd.f32 %v2003_v2, %v736_v40  ;;  %v796_v25 = vadd.f32 %v2006_v3, %v748_v59  ;;  %v2977_v21 = vrot.slane %v2976_v0, 7  ;;  %v2978_v56 = vrot.slane %v2264_v54, 6 }
 0x297   :  { %v2979_v60 = vrot.slane %v2976_v0, 6  ;;  %v929_v37 = vadd.f32 %v925_v35, %v910_v48  ;;  %v808_v2 = vadd.f32 %v2024_v10, %v760_v30  ;;  %v820_v3 = vadd.f32 %v2027_v23, %v772_v47 }
 0x298   :  { %v2429_v33 = vsel %vm339_vm1, %v2977_v21, %v2975_v26  ;;  %v832_v32 = vadd.f32 %v2051_v20, %v784_v62  ;;  %v843_v51 = vadd.f32 %v2054_v12, %v796_v25  ;;  %v2980_v41 = vrot.slane %v2264_v54, 5 }
 0x299   :  { %v2437_v15 = vsel %vm361_vm2, %v2979_v60, %v2978_v56  ;;  %v499_v44 = vmul.f32 %v2178_v7, %v2429_v33  ;;  %v2981_v5 = vrot.slane %v2976_v0, 5  ;;  %v2455_v10 = vadd.f32 %v929_v37, %v921_v50 }
 0x29a   :  { %v520_v43 = vmul.f32 %v2188_v28, %v2437_v15  ;;  %v854_v23 = vadd.f32 %v2086_v34, %v808_v2  ;;  %v865_v7 = vadd.f32 %v2089_v1, %v820_v3  ;;  %v876_v46 = vadd.f32 %v2107_v38, %v832_v32 }
 0x29b   :  { %v2453_v35 = vsel %vm530_vm3, %v2981_v5, %v2980_v41  ;;  %2982 = vst [vmem:[#allocation31_spill] sm:$0xff] %v2455_v10  ;;  %v887_v4 = vadd.f32 %v2968_v17, %v843_v51  ;;  %v2983_v53 = vrot.slane %v2264_v54, 4  ;;  %v2984_v48 = vrot.slane %v2976_v0, 4  ;;  %942 = vrot.lane.b32.xlu1 %v2455_v10, %s1649_s13 }
 0x29c   :  { %v542_v20 = vmul.f32 %v2195_v13, %v2453_v35  ;;  %v2985_v50 = vrot.slane %v2264_v54, 3  ;;  %v2986_v40 = vrot.slane %v2976_v0, 3  ;;  %v898_v30 = vadd.f32 %v2969_v45, %v854_v23  ;;  %v2992_v23 = vld [vmem:[#allocation37_spill] sm:$0xff] }
 0x29d   :  { %v2469_v52 = vsel %vm552_vm4, %v2984_v48, %v2983_v53  ;;  %v909_v47 = vadd.f32 %v2972_v39, %v865_v7  ;;  %v920_v26 = vadd.f32 %v2973_v55, %v876_v46  ;;  %v2987_v21 = vrot.slane %v2264_v54, 2  ;;  %v2993_v46 = vld [vmem:[#allocation39_spill] sm:$0xff]  ;;  %v2994_v48 = vld [vmem:[#allocation41_spill] sm:$0xff] }
 0x29e   :  { %v2477_v59 = vsel %vm574_vm5, %v2986_v40, %v2985_v50  ;;  %v564_v62 = vmul.f32 %v2204_v36, %v2469_v52  ;;  %v2988_v56 = vrot.slane %v2976_v0, 2  ;;  %v2989_v37 = vrot.slane %v2264_v54, 1 }
 0x29f   :  { %v586_v25 = vmul.f32 %v2209_v22, %v2477_v59  ;;  %v2990_v2 = vrot.slane %v2976_v0, 1  ;;  %v643_v22 = vmul.f32 %v2021_v8, %v2976_v0  ;;  %v924_v3 = vadd.f32 %v898_v30, %v887_v4 }
 0x2a0   :  { %v2494_v60 = vsel %vm596_vm6, %v2988_v56, %v2987_v21  ;;  %v568_v32 = vadd.f32 %v564_v62, %v482_v61  ;;  %v656_v7 = vmul.f32 %v2043_v18, %v2992_v23  ;;  %v669_v53 = vmul.f32 %v2048_v19, %v2993_v46  ;;  %v2995_v61 = vld [vmem:[#allocation43_spill] sm:$0xff] }
 0x2a1   :  { %v2502_v36 = vsel %vm618_vm7, %v2990_v2, %v2989_v37  ;;  %v590_v51 = vadd.f32 %v586_v25, %v499_v44  ;;  %v608_v41 = vmul.f32 %v2277_v63, %v2494_v60  ;;  %v682_v50 = vmul.f32 %v2073_v29, %v2994_v48  ;;  %v2996_v25 = vld [vmem:[#allocation45_spill] sm:$0xff]  ;;  %v2997_v56 = vld [vmem:[#allocation23_spill] sm:$0xff]  ;;  %v2998_v2 = vld [vmem:[#allocation46_spill] sm:$0xff] }
 0x2a2   :  { %2991 = vst [vmem:[#allocation26_spill] sm:$0xff] %v2502_v36  ;;  %v630_v5 = vmul.f32 %v2286_v49, %v2502_v36  ;;  %v928_v40 = vadd.f32 %v924_v3, %v909_v47  ;;  %v647_v4 = vadd.f32 %v643_v22, %v568_v32  ;;  %v695_v44 = vmul.f32 %v2078_v31, %v2995_v61  ;;  %v3000_v36 = vld [vmem:[#allocation48_spill] sm:$0xff]  ;;  %v3001_v3 = vld [vmem:[#allocation10_spill] sm:$0xff] }
 0x2a3   :  { %v612_v21 = vadd.f32 %v608_v41, %v520_v43  ;;  %v660_v62 = vadd.f32 %v656_v7, %v590_v51  ;;  %v708_v37 = vmul.f32 %v2997_v56, %v2996_v25  ;;  %v721_v10 = vmul.f32 %v2126_v42, %v2998_v2  ;;  %v3004_v7 = vld [vmem:[#allocation13_spill] sm:$0xff] }
 0x2a4   :  { %v634_v30 = vadd.f32 %v630_v5, %v542_v20  ;;  %v2522_v23 = vadd.f32 %v928_v40, %v920_v26  ;;  %v699_v0 = vadd.f32 %v695_v44, %v647_v4  ;;  %v734_v47 = vmul.f32 %v2143_v27, %v3000_v36  ;;  %v3002_v20 = vld [vmem:[#allocation11_spill] sm:$0xff]  ;;  %v3003_v26 = vld [vmem:[#allocation12_spill] sm:$0xff]  ;;  %v3005_v40 = vld [vmem:[#allocation14_spill] sm:$0xff] }
 0x2a5   :  { %v673_v46 = vadd.f32 %v669_v53, %v612_v21  ;;  %v712_v22 = vadd.f32 %v708_v37, %v660_v62  ;;  %v746_v32 = vmul.f32 %v3001_v3, %v2173_v24  ;;  %v758_v51 = vmul.f32 %v3002_v20, %v2219_v11  ;;  %v3007_v11 = vld [vmem:[#allocation17_spill] sm:$0xff] }
 0x2a6   :  { %2999 = vst [vmem:[#allocation27_spill] sm:$0xff] %v2522_v23  ;;  %v686_v43 = vadd.f32 %v682_v50, %v634_v30  ;;  %940 = vrot.lane.b32.xlu0 %v2522_v23, %s1649_s13  ;;  %v770_v5 = vmul.f32 %v3003_v26, %v2229_v6  ;;  %v782_v53 = vmul.f32 %v3004_v7, %v2243_v14  ;;  %v3006_v30 = vld [vmem:[#allocation15_spill] sm:$0xff] }
 0x2a7   :  { %v725_v41 = vadd.f32 %v721_v10, %v673_v46  ;;  %v794_v50 = vmul.f32 %v3005_v40, %v2255_v9  ;;  %v750_v4 = vadd.f32 %v746_v32, %v699_v0  ;;  %v762_v44 = vadd.f32 %v758_v51, %v712_v22  ;;  %v3008_v10 = vld [vmem:[#allocation50_spill] sm:$0xff]  ;;  %v3010_v6 = vld [vmem:[#allocation51_spill] sm:$0xff]  ;;  %v3011_v9 = vld [vmem:[#allocation49_spill] sm:$0xff] }
 0x2a8   :  { %v738_v21 = vadd.f32 %v734_v47, %v686_v43  ;;  %v806_v62 = vmul.f32 %v3006_v30, %v2270_v58  ;;  %v818_v23 = vmul.f32 %v3007_v11, %v2299_v57  ;;  %v3009_v46 = vld [vmem:[#allocation18_spill] sm:$0xff]  ;;  %v521_v36 = vmul.f32 %v2188_v28, %v3010_v6  ;;  %v3014_v51 = vld [vmem:[#allocation52_spill] sm:$0xff] }
 0x2a9   :  { %v774_v37 = vadd.f32 %v770_v5, %v725_v41  ;;  %v830_v24 = vmul.f32 %v3009_v46, %v3008_v10  ;;  %v798_v2 = vadd.f32 %v794_v50, %v750_v4  ;;  %v3012_v47 = vrot.slane %v3011_v9, 5  ;;  %v3015_v41 = vld [vmem:[#allocation54_spill] sm:$0xff]  ;;  %v3016_v10 = vld [vmem:[#allocation53_spill] sm:$0xff] }
 0x2aa   :  { %v786_v14 = vadd.f32 %v782_v53, %v738_v21  ;;  %v810_v25 = vadd.f32 %v806_v62, %v762_v44  ;;  %v3013_v0 = vrot.slane %v2264_v54, 5  ;;  %v591_v5 = vadd.f32 %v3015_v41, %v3014_v51  ;;  %v3026_v51 = vld [vmem:[#allocation48_spill] sm:$0xff] }
 0x2ab   :  { %v822_v22 = vadd.f32 %v818_v23, %v774_v37  ;;  %v609_v57 = vmul.f32 %v2277_v63, %v3016_v10  ;;  %v845_v28 = vadd.f32 %v2054_v12, %v798_v2  ;;  %v3017_v50 = vrot.slane %v3011_v9, 1  ;;  %v3022_v37 = vld [vmem:[#allocation37_spill] sm:$0xff] }
 0x2ac   :  { %v531_v43 = vsel %vm530_vm3, %v3013_v0, %v3012_v47  ;;  %v834_v6 = vadd.f32 %v830_v24, %v786_v14  ;;  %v856_v53 = vadd.f32 %v2086_v34, %v810_v25  ;;  %v3018_v21 = vrot.slane %v2264_v54, 1  ;;  %v3019_v25 = vld [vmem:[#allocation55_spill] sm:$0xff] }
 0x2ad   :  { %v543_v32 = vmul.f32 %v2195_v13, %v531_v43  ;;  %v867_v13 = vadd.f32 %v2089_v1, %v822_v22  ;;  %v613_v4 = vadd.f32 %v609_v57, %v521_v36  ;;  %v644_v63 = vmul.f32 %v2021_v8, %v2264_v54  ;;  %v3025_v22 = vld [vmem:[#allocation46_spill] sm:$0xff] }
 0x2ae   :  { %v619_v23 = vsel %vm618_vm7, %v3018_v21, %v3017_v50  ;;  %v878_v24 = vadd.f32 %v2107_v38, %v834_v6  ;;  %v889_v12 = vadd.f32 %v2968_v17, %v845_v28  ;;  %v900_v34 = vadd.f32 %v2969_v45, %v856_v53  ;;  %v3029_v28 = vld [vmem:[#allocation38_spill] sm:$0xff]  ;;  %v3031_v50 = vld [vmem:[#allocation40_spill] sm:$0xff] }
 0x2af   :  { %v631_v44 = vmul.f32 %v2286_v49, %v619_v23  ;;  %v657_v9 = vmul.f32 %v2043_v18, %v2429_v33  ;;  %v911_v16 = vadd.f32 %v2972_v39, %v867_v13  ;;  %v648_v1 = vadd.f32 %v644_v63, %v3019_v25  ;;  %v3032_v21 = vld [vmem:[#allocation20_spill] sm:$0xff]  ;;  %v3033_v13 = vld [vmem:[#allocation42_spill] sm:$0xff] }
 0x2b0   :  { %v670_v57 = vmul.f32 %v2048_v19, %v2437_v15  ;;  %v922_v49 = vadd.f32 %v2973_v55, %v878_v24  ;;  %v926_v54 = vadd.f32 %v900_v34, %v889_v12  ;;  %v683_v38 = vmul.f32 %v2073_v29, %v2453_v35  ;;  %v3020_v19 = vld [vmem:[#allocation26_spill] sm:$0xff]  ;;  %v3035_v24 = vld [vmem:[#allocation44_spill] sm:$0xff] }
 0x2b1   :  { %v635_v14 = vadd.f32 %v631_v44, %v543_v32  ;;  %v661_v8 = vadd.f32 %v657_v9, %v591_v5  ;;  %v696_v45 = vmul.f32 %v2078_v31, %v2469_v52  ;;  %v709_v18 = vmul.f32 %v2997_v56, %v2477_v59  ;;  %v3021_v15 = vld [vmem:[#allocation34_spill] sm:$0xff]  ;;  %v3023_v59 = vld [vmem:[#allocation39_spill] sm:$0xff]  ;;  %v3028_v5 = vld [vmem:[#allocation16_spill] sm:$0xff] }
 0x2b2   :  { %v674_v17 = vadd.f32 %v670_v57, %v613_v4  ;;  %v722_v39 = vmul.f32 %v2126_v42, %v2494_v60  ;;  %v930_v33 = vadd.f32 %v926_v54, %v911_v16  ;;  %v735_v55 = vmul.f32 %v2143_v27, %v3020_v19  ;;  %v3034_v4 = vld [vmem:[#allocation21_spill] sm:$0xff]  ;;  %v3037_v34 = vld [vmem:[#allocation24_spill] sm:$0xff]  ;;  %v3038_v57 = vld [vmem:[#allocation47_spill] sm:$0xff] }
 0x2b3   :  { %v687_v36 = vadd.f32 %v683_v38, %v635_v14  ;;  %v747_v2 = vmul.f32 %v3001_v3, %v3021_v15  ;;  %v700_v62 = vadd.f32 %v696_v45, %v648_v1  ;;  %v713_v29 = vadd.f32 %v709_v18, %v661_v8  ;;  %v3024_v3 = vld [vmem:[#allocation45_spill] sm:$0xff]  ;;  %v3040_v38 = vld [vmem:[#allocation50_spill] sm:$0xff] }
 0x2b4   :  { %v726_v35 = vadd.f32 %v722_v39, %v674_v17  ;;  %v759_v31 = vmul.f32 %v3002_v20, %v3022_v37  ;;  %v934_v52 = vadd.f32 %v930_v33, %v922_v49  ;;  %v771_v56 = vmul.f32 %v3003_v26, %v3023_v59  ;;  %v3039_v49 = vld [vmem:[#allocation25_spill] sm:$0xff]  ;;  %v3041_v17 = vld [vmem:[#allocation28_spill] sm:$0xff]  ;;  %v960_v19 = vld [vmem:[%s2830_s4] sm:$0xff] }
 0x2b5   :  { %v739_v10 = vadd.f32 %v735_v55, %v687_v36  ;;  %v783_v42 = vmul.f32 %v3004_v7, %v2994_v48  ;;  %v751_v60 = vadd.f32 %v747_v2, %v700_v62  ;;  %v795_v27 = vmul.f32 %v3005_v40, %v2995_v61  ;;  %v3027_v7 = vld [vmem:[#allocation36_spill] sm:$0xff]  ;;  %v3030_v61 = vld [vmem:[#allocation19_spill] sm:$0xff]  ;;  %v963_v2 = vld [vmem:[%s2830_s4 + $0x18] sm:$0xff] }
 0x2b6   :  { %v763_v47 = vadd.f32 %v759_v31, %v713_v29  ;;  %v807_v0 = vmul.f32 %v3006_v30, %v3024_v3  ;;  %944 = vrot.lane.b32.xlu0 %v934_v52, %s1649_s13  ;;  %v775_v43 = vadd.f32 %v771_v56, %v726_v35  ;;  %v819_v32 = vmul.f32 %v3007_v11, %v3025_v22  ;;  %v962_v55 = vld [vmem:[%s2830_s4 + $0x10] sm:$0xff]  ;;  %v3042_v35 = vld [vmem:[#allocation6_spill] sm:$0xff] }
 0x2b7   :  { %v787_v20 = vadd.f32 %v783_v42, %v739_v10  ;;  %v831_v26 = vmul.f32 %v3009_v46, %v3026_v51  ;;  %v799_v41 = vadd.f32 %v795_v27, %v751_v60  ;;  %v842_v6 = vmul.f32 %v3028_v5, %v3027_v7  ;;  %v3036_v46 = vld [vmem:[#allocation22_spill] sm:$0xff]  ;;  %v3043_v10 = vld [vmem:[#allocation7_spill] sm:$0xff]  ;;  %v3044_v42 = vld [vmem:[#allocation9_spill] sm:$0xff] }
 0x2b8   :  { %v811_v48 = vadd.f32 %v807_v0, %v763_v47  ;;  %v853_v40 = vmul.f32 %v3030_v61, %v3029_v28  ;;  %v823_v53 = vadd.f32 %v819_v32, %v775_v43  ;;  %v864_v23 = vmul.f32 %v3032_v21, %v3031_v50  ;;  %v3045_v47 = vld [vmem:[#allocation3_spill] sm:$0xff]  ;;  %v3047_v0 = vld [vmem:[#allocation4_spill] sm:$0xff]  ;;  %v3049_v51 = vld [vmem:[#allocation2_spill] sm:$0xff] }
 0x2b9   :  { %v835_v30 = vadd.f32 %v831_v26, %v787_v20  ;;  %v875_v44 = vmul.f32 %v3034_v4, %v3033_v13  ;;  %v846_v11 = vadd.f32 %v842_v6, %v799_v41  ;;  %v886_v12 = vmul.f32 %v3036_v46, %v3035_v24  ;;  %v3046_v27 = vld [vmem:[#allocation27_spill] sm:$0xff]  ;;  %v3048_v22 = vld [vmem:[#allocation8_spill] sm:$0xff]  ;;  %v1461_v50 = vld [vmem:[%s2827_s6 + $0x2] ss:$0 sm:$0xff] }
 0x2ba   :  { %v857_v63 = vadd.f32 %v853_v40, %v811_v48  ;;  %v897_v9 = vmul.f32 %v3037_v34, %v2270_v58  ;;  %v868_v16 = vadd.f32 %v864_v23, %v823_v53  ;;  %v908_v54 = vmul.f32 %v3039_v49, %v3038_v57  ;;  %v961_v58 = vld [vmem:[%s2830_s4 + $0x8] sm:$0xff]  ;;  %v3051_v48 = vld [vmem:[#allocation5_spill] sm:$0xff] }
 0x2bb   :  { %v879_v14 = vadd.f32 %v875_v44, %v835_v30  ;;  %v890_v25 = vadd.f32 %v886_v12, %v846_v11  ;;  %v919_v45 = vmul.f32 %v3041_v17, %v3040_v38  ;;  %v1585_v15 = vpack.c.bf16 %v961_v58, %v960_v19  ;;  %v3050_v26 = vld [vmem:[#allocation31_spill] sm:$0xff]  ;;  %v1643_v38 = vld [vmem:[%s2825_s0 + $0x10] sm:$0xff] }
 0x2bc   :  { %v901_v1 = vadd.f32 %v897_v9, %v857_v63  ;;  %v912_v8 = vadd.f32 %v908_v54, %v868_v16  ;;  %v1589_v62 = vpack.c.bf16 %v963_v2, %v962_v55  ;;  %v956_v3 = vmul.f32 %v3046_v27, %v3045_v47  ;;  %v1640_v44 = vld [vmem:[%s2825_s0 + $0x8] sm:$0xff]  ;;  %v1641_v63 = vld [vmem:[%s2825_s0] sm:$0xff]  ;;  %v1642_v54 = vld [vmem:[%s2825_s0 + $0x18] sm:$0xff] }
 0x2bd   :  { %v923_v39 = vadd.f32 %v919_v45, %v879_v14  ;;  %1586 = vmatprep.subr.bf16.mxu1 %v1585_v15  ;;  %v958_v43 = vmul.f32 %v934_v52, %v3047_v0  ;;  %v957_v41 = vmul.f32 %v3050_v26, %v3049_v51  ;;  %v1644_v2 = vld [vmem:[%s2825_s0 + $0x28] sm:$0xff] }
 0x2be   :  { %v927_v18 = vadd.f32 %v901_v1, %v890_v25  ;;  %1588 = vmatpush3.bf16.msra.mxu1 %v1585_v15 }
 0x2bf   :  { %1590 = vmatprep.subr.bf16.mxu1 %v1589_v62 }
 0x2c0   :  { %v931_v33 = vadd.f32 %v927_v18, %v912_v8 }
 0x2c2   :  { %v935_v36 = vadd.f32 %v931_v33, %v923_v39  ;;  %1592 = vmatpush3.bf16.msra.mxu1 %v1589_v62 }
 0x2c4   :  { %946 = vrot.lane.b32.xlu1 %v935_v36, %s1649_s13  ;;  %v959_v7 = vmul.f32 %v935_v36, %v3051_v48 }
 0x30d   :  { %v943_v29 = vpop.permute.xlu1 %942 }
 0x30e   :  { %v953_v37 = vmul.f32 %v943_v29, %v3042_v35 }
 0x310   :  { %978 = vrot.lane.b32.xlu1 %v953_v37, %s1650_s2  ;;  %v1645_v37 = vld [vmem:[%s2825_s0 + $0x20] sm:$0xff] }
 0x318   :  { %v941_v31 = vpop.permute.xlu0 %940 }
 0x319   :  { %v952_v59 = vmul.f32 %v941_v31, %v3043_v10 }
 0x31b   :  { %976 = vrot.lane.b32.xlu0 %v952_v59, %s1650_s2 }
 0x328   :  { %v945_v56 = vpop.permute.xlu0 %944 }
 0x329   :  { %v954_v60 = vmul.f32 %v945_v56, %v3044_v42 }
 0x32b   :  { %980 = vrot.lane.b32.xlu0 %v954_v60, %s1650_s2 }
 0x32f   :  { %984 = vrot.lane.b32.xlu0 %v956_v3, %s1650_s2  ;;  %v1646_v3 = vld [vmem:[%s2825_s0 + $0x38] sm:$0xff] }
 0x333   :  { %988 = vrot.lane.b32.xlu0 %v958_v43, %s1650_s2 }
 0x336   :  { %v947_v20 = vpop.permute.xlu1 %946 }
 0x337   :  { %v955_v32 = vmul.f32 %v947_v20, %v3048_v22  ;;  %v1647_v20 = vld [vmem:[%s2825_s0 + $0x30] sm:$0xff] }
 0x339   :  { %982 = vrot.lane.b32.xlu1 %v955_v32, %s1650_s2 }
 0x33d   :  { %986 = vrot.lane.b32.xlu1 %v957_v41, %s1650_s2 }
 0x341   :  { %990 = vrot.lane.b32.xlu1 %v959_v7, %s1650_s2 }
 0x382   :  { %v979_v5 = vpop.permute.xlu1 %978 }
 0x38d   :  { %v977_v6 = vpop.permute.xlu0 %976 }
 0x38e   :  { %1545 = vmatprep.mubr.msk.f32.mxu1 %vm41_vm0, %v977_v6  ;;  %v1265_v6 = vld [vmem:[%s2831_s5] sm:$0xff] }
 0x38f   :  { %1546 = vmatmul.mubr.msk.f32.vlgmr.msra.gmra.mrb[4].mxu1 %vm41_vm0, %v979_v5 }
 0x39d   :  { %v981_v28 = vpop.permute.xlu0 %980 }
 0x39e   :  { %1548 = vmatprep.mubr.msk.f32.mxu1 %vm41_vm0, %v981_v28  ;;  %v1266_v28 = vld [vmem:[%s2831_s5 + $0x8] sm:$0xff] }
 0x3a1   :  { %v985_v52 = vpop.permute.xlu0 %984 }
 0x3a5   :  { %v989_v40 = vpop.permute.xlu0 %988 }
 0x3ab   :  { %v983_v61 = vpop.permute.xlu1 %982 }
 0x3ac   :  { %1549 = vmatmul.mubr.msk.f32.gmra.mrb[6].mxu1 %vm41_vm0, %v983_v61  ;;  %v1593_v61 = vpack.c.bf16 %v1266_v28, %v1265_v6 }
 0x3ad   :  { %1551 = vmatprep.mubr.msk.f32.mxu1 %vm41_vm0, %v985_v52  ;;  %v1267_v52 = vld [vmem:[%s2831_s5 + $0x10] sm:$0xff] }
 0x3ae   :  { %1594 = vmatprep.subr.bf16.mxu0 %v1593_v61 }
 0x3af   :  { %v987_v53 = vpop.permute.xlu1 %986  ;;  %1596 = vmatpush3.bf16.msra.mxu0 %v1593_v61 }
 0x3b0   :  { %1552 = vmatmul.mubr.msk.f32.gmra.mrb[8].mxu1 %vm41_vm0, %v987_v53 }
 0x3b1   :  { %1554 = vmatprep.mubr.msk.f32.mxu1 %vm41_vm0, %v989_v40  ;;  %v1268_v40 = vld [vmem:[%s2831_s5 + $0x18] sm:$0xff] }
 0x3b2   :  { %v1597_v53 = vpack.c.bf16 %v1268_v40, %v1267_v52 }
 0x3b3   :  { %v991_v30 = vpop.permute.xlu1 %990 }
 0x3b4   :  { %1555 = vmatmul.mubr.msk.f32.gmra.mrb[10].mxu1 %vm41_vm0, %v991_v30  ;;  %1598 = vmatprep.subr.bf16.mxu0 %v1597_v53 }
 0x3b5   :  { %1600 = vmatpush3.bf16.msra.mxu0 %v1597_v53 }
 0x462   :  { %v1547_v21 = vpop.f32.mrb[4].mxu1 }
 0x463   :  { %v1080_v23 = vadd.f32 %v1547_v21, %v1461_v50  ;;  %v1074_v13 = vpop.f32.mrb[5].mxu1 }
 0x464   :  { %v1075_v4 = vadd.f32 %v1461_v50, %v1074_v13 }
 0x465   :  { %v2659_v11 = vadd.f32 %v1640_v44, %v1080_v23 }
 0x466   :  { %v2664_v24 = vadd.f32 %v1641_v63, %v1075_v4 }
 0x467   :  { %v1124_v46 = vsel %vm41_vm0, %v2659_v11, 0.0  ;;  %v1154_v34 = vmul.f32 %v2659_v11, %v2659_v11 }
 0x468   :  { %1125 = vadd.xlane.f32.xlu1 %v1124_v46  ;;  %v1121_v12 = vsel %vm41_vm0, %v2664_v24, 0.0  ;;  %v1153_v16 = vmul.f32 %v2664_v24, %v2664_v24 }
 0x469   :  { %1122 = vadd.xlane.f32.xlu0 %v1121_v12  ;;  %v1164_v9 = vsel %vm41_vm0, %v1154_v34, 0.0 }
 0x46a   :  { %v1161_v14 = vsel %vm41_vm0, %v1153_v16, 0.0 }
 0x46d   :  { %1165 = vadd.xlane.f32.xlu0 %v1164_v9 }
 0x471   :  { %1162 = vadd.xlane.f32.xlu0 %v1161_v14 }
 0x47f   :  { %v1550_v25 = vpop.f32.mrb[6].mxu1 }
 0x480   :  { %v1090_v1 = vadd.f32 %v1550_v25, %v1461_v50  ;;  %v1084_v57 = vpop.f32.mrb[7].mxu1 }
 0x481   :  { %v1085_v49 = vadd.f32 %v1461_v50, %v1084_v57 }
 0x482   :  { %v2679_v8 = vadd.f32 %v1642_v54, %v1090_v1  ;;  %v2753_v54 = vld [vmem:[%s2827_s6 + $0x3] ss:$0 sm:$0xff] }
 0x483   :  { %v2684_v17 = vadd.f32 %v1643_v38, %v1085_v49  ;;  %v1553_v45 = vpop.f32.mrb[8].mxu1 }
 0x484   :  { %v1100_v18 = vadd.f32 %v1553_v45, %v1461_v50  ;;  %v1094_v39 = vpop.f32.mrb[9].mxu1  ;;  %v1130_v33 = vsel %vm41_vm0, %v2679_v8, 0.0  ;;  %v1156_v36 = vmul.f32 %v2679_v8, %v2679_v8 }
 0x485   :  { %v1095_v19 = vadd.f32 %v1461_v50, %v1094_v39  ;;  %1131 = vadd.xlane.f32.xlu1 %v1130_v33  ;;  %v1127_v58 = vsel %vm41_vm0, %v2684_v17, 0.0  ;;  %v1155_v55 = vmul.f32 %v2684_v17, %v2684_v17 }
 0x486   :  { %1128 = vadd.xlane.f32.xlu0 %v1127_v58  ;;  %v2697_v62 = vadd.f32 %v1644_v2, %v1100_v18  ;;  %v1170_v35 = vsel %vm41_vm0, %v1156_v36, 0.0 }
 0x487   :  { %v1556_v15 = vpop.f32.mrb[10].mxu1  ;;  %v2703_v31 = vadd.f32 %v1645_v37, %v1095_v19  ;;  %v1167_v10 = vsel %vm41_vm0, %v1155_v55, 0.0 }
 0x488   :  { %v1104_v29 = vpop.f32.mrb[11].mxu1  ;;  %v1110_v59 = vadd.f32 %v1556_v15, %v1461_v50  ;;  %v1136_v56 = vsel %vm41_vm0, %v2697_v62, 0.0  ;;  %v1158_v42 = vmul.f32 %v2697_v62, %v2697_v62 }
 0x489   :  { %1171 = vadd.xlane.f32.xlu1 %v1170_v35  ;;  %v1105_v60 = vadd.f32 %v1461_v50, %v1104_v29  ;;  %v1133_v47 = vsel %vm41_vm0, %v2703_v31, 0.0  ;;  %v1157_v27 = vmul.f32 %v2703_v31, %v2703_v31 }
 0x48a   :  { %1168 = vadd.xlane.f32.xlu0 %v1167_v10  ;;  %v2717_v0 = vadd.f32 %v1646_v3, %v1110_v59  ;;  %v1176_v43 = vsel %vm41_vm0, %v1158_v42, 0.0 }
 0x48b   :  { %v2723_v22 = vadd.f32 %v1647_v20, %v1105_v60  ;;  %v1173_v32 = vsel %vm41_vm0, %v1157_v27, 0.0 }
 0x48c   :  { %v1142_v51 = vsel %vm41_vm0, %v2717_v0, 0.0  ;;  %v1160_v26 = vmul.f32 %v2717_v0, %v2717_v0 }
 0x48d   :  { %1137 = vadd.xlane.f32.xlu1 %v1136_v56  ;;  %v1139_v41 = vsel %vm41_vm0, %v2723_v22, 0.0  ;;  %v1159_v48 = vmul.f32 %v2723_v22, %v2723_v22 }
 0x48e   :  { %1134 = vadd.xlane.f32.xlu0 %v1133_v47  ;;  %v1182_v7 = vsel %vm41_vm0, %v1160_v26, 0.0 }
 0x48f   :  { %v1179_v5 = vsel %vm41_vm0, %v1159_v48, 0.0 }
 0x491   :  { %1177 = vadd.xlane.f32.xlu1 %v1176_v43 }
 0x492   :  { %1174 = vadd.xlane.f32.xlu0 %v1173_v32 }
 0x495   :  { %1143 = vadd.xlane.f32.xlu1 %v1142_v51 }
 0x496   :  { %1140 = vadd.xlane.f32.xlu0 %v1139_v41 }
 0x499   :  { %1183 = vadd.xlane.f32.xlu1 %v1182_v7 }
 0x49a   :  { %1180 = vadd.xlane.f32.xlu0 %v1179_v5 }
 0x4f5   :  { %v1126_v30 = vpop.xlane.xlu1 %1125 }
 0x4f6   :  { %v1123_v50 = vpop.xlane.xlu0 %1122  ;;  %v1146_v21 = vmul.f32 0.03125, %v1126_v30 }
 0x4f7   :  { %v1145_v4 = vmul.f32 0.03125, %v1123_v50 }
 0x4f8   :  { %v1194_v13 = vmul.f32 %v1146_v21, %v1146_v21  ;;  %v1210_v1 = vsub.f32 %v2659_v11, %v1146_v21  ;;  %v2759_v11 = vld [vmem:[%s2827_s6 + $0x4] ss:$0 sm:$0xff] }
 0x4f9   :  { %v1193_v12 = vmul.f32 %v1145_v4, %v1145_v4  ;;  %v1209_v49 = vsub.f32 %v2664_v24, %v1145_v4 }
 0x4fa   :  { %v1166_v23 = vpop.xlane.xlu0 %1165 }
 0x4fb   :  { %v1186_v44 = vmul.f32 0.03125, %v1166_v23 }
 0x4fd   :  { %v1202_v63 = vsub.f32 %v1186_v44, %v1194_v13 }
 0x4fe   :  { %v1163_v46 = vpop.xlane.xlu0 %1162 }
 0x4ff   :  { %v1218_v34 = vadd.f32 1e-05, %v1202_v63  ;;  %v1185_v9 = vmul.f32 0.03125, %v1163_v46 }
 0x501   :  { %1624 = vrsqrt.f32 %v1218_v34  ;;  %v1201_v16 = vsub.f32 %v1185_v9, %v1193_v12 }
 0x503   :  { %v1217_v14 = vadd.f32 1e-05, %v1201_v16 }
 0x505   :  { %1626 = vrsqrt.f32 %v1217_v14 }
 0x50b   :  { %v1625_v25 = vpop.eup %1624 }
 0x50c   :  { %v1234_v57 = vmul.f32 %v1625_v25, %v1210_v1 }
 0x50e   :  { %v1246_v39 = vmul.f32 %v2753_v54, %v1234_v57 }
 0x50f   :  { %v1627_v38 = vpop.eup %1626 }
 0x510   :  { %v1233_v18 = vmul.f32 %v1627_v38, %v1209_v49  ;;  %v1258_v35 = vadd.f32 %v2759_v11, %v1246_v39 }
 0x512   :  { %v1132_v45 = vpop.xlane.xlu1 %1131  ;;  %v1245_v24 = vmul.f32 %v2753_v54, %v1233_v18 }
 0x513   :  { %v1148_v33 = vmul.f32 0.03125, %v1132_v45  ;;  %v1129_v36 = vpop.xlane.xlu0 %1128 }
 0x514   :  { %v1147_v19 = vmul.f32 0.03125, %v1129_v36  ;;  %v1257_v55 = vadd.f32 %v2759_v11, %v1245_v24 }
 0x515   :  { %v1196_v15 = vmul.f32 %v1148_v33, %v1148_v33  ;;  %v1212_v30 = vsub.f32 %v2679_v8, %v1148_v33 }
 0x516   :  { %v1172_v58 = vpop.xlane.xlu1 %1171  ;;  %v1195_v37 = vmul.f32 %v1147_v19, %v1147_v19  ;;  %1565 = vmatprep.mubr.msk.f32.mxu0 %vm41_vm0, %v1257_v55  ;;  %v1211_v23 = vsub.f32 %v2684_v17, %v1147_v19 }
 0x517   :  { %v1188_v2 = vmul.f32 0.03125, %v1172_v58  ;;  %v1169_v29 = vpop.xlane.xlu0 %1168  ;;  %1566 = vmatmul.mubr.msk.f32.vlgmr.msra.gmra.mrb[4].mxu0 %vm41_vm0, %v1258_v35 }
 0x518   :  { %v1187_v10 = vmul.f32 0.03125, %v1169_v29 }
 0x519   :  { %v1204_v59 = vsub.f32 %v1188_v2, %v1196_v15 }
 0x51a   :  { %v1203_v56 = vsub.f32 %v1187_v10, %v1195_v37  ;;  %v1138_v42 = vpop.xlane.xlu1 %1137 }
 0x51b   :  { %v1220_v60 = vadd.f32 1e-05, %v1204_v59  ;;  %v1150_v47 = vmul.f32 0.03125, %v1138_v42  ;;  %v1135_v27 = vpop.xlane.xlu0 %1134 }
 0x51c   :  { %v1219_v3 = vadd.f32 1e-05, %v1203_v56  ;;  %v1149_v43 = vmul.f32 0.03125, %v1135_v27 }
 0x51d   :  { %1628 = vrsqrt.f32 %v1220_v60  ;;  %v1198_v32 = vmul.f32 %v1150_v47, %v1150_v47  ;;  %v1214_v17 = vsub.f32 %v2697_v62, %v1150_v47 }
 0x51e   :  { %1630 = vrsqrt.f32 %v1219_v3  ;;  %v1178_v20 = vpop.xlane.xlu1 %1177  ;;  %v1197_v41 = vmul.f32 %v1149_v43, %v1149_v43  ;;  %v1213_v18 = vsub.f32 %v2703_v31, %v1149_v43 }
 0x51f   :  { %v1190_v51 = vmul.f32 0.03125, %v1178_v20  ;;  %v1175_v26 = vpop.xlane.xlu0 %1174 }
 0x520   :  { %v1189_v48 = vmul.f32 0.03125, %v1175_v26 }
 0x521   :  { %v1206_v7 = vsub.f32 %v1190_v51, %v1198_v32 }
 0x522   :  { %v1205_v5 = vsub.f32 %v1189_v48, %v1197_v41  ;;  %v1144_v6 = vpop.xlane.xlu1 %1143 }
 0x523   :  { %v1222_v28 = vadd.f32 1e-05, %v1206_v7  ;;  %v1152_v52 = vmul.f32 0.03125, %v1144_v6  ;;  %v1141_v61 = vpop.xlane.xlu0 %1140 }
 0x524   :  { %v1221_v40 = vadd.f32 1e-05, %v1205_v5  ;;  %v1151_v53 = vmul.f32 0.03125, %v1141_v61 }
 0x525   :  { %1632 = vrsqrt.f32 %v1222_v28  ;;  %v1200_v13 = vmul.f32 %v1152_v52, %v1152_v52  ;;  %v1216_v62 = vsub.f32 %v2717_v0, %v1152_v52 }
 0x526   :  { %1634 = vrsqrt.f32 %v1221_v40  ;;  %v1184_v50 = vpop.xlane.xlu1 %1183  ;;  %v1199_v46 = vmul.f32 %v1151_v53, %v1151_v53  ;;  %v1215_v31 = vsub.f32 %v2723_v22, %v1151_v53  ;;  %v1472_v22 = vld [vmem:[%s2827_s6 + $0x5] ss:$0 sm:$0xff] }
 0x527   :  { %v1629_v21 = vpop.eup %1628  ;;  %v1192_v4 = vmul.f32 0.03125, %v1184_v50  ;;  %v1181_v44 = vpop.xlane.xlu0 %1180 }
 0x528   :  { %v1631_v63 = vpop.eup %1630  ;;  %v1191_v12 = vmul.f32 0.03125, %v1181_v44  ;;  %v1236_v34 = vmul.f32 %v1629_v21, %v1212_v30 }
 0x529   :  { %v1208_v9 = vsub.f32 %v1192_v4, %v1200_v13  ;;  %v1235_v16 = vmul.f32 %v1631_v63, %v1211_v23 }
 0x52a   :  { %v1207_v14 = vsub.f32 %v1191_v12, %v1199_v46  ;;  %v1248_v25 = vmul.f32 %v2753_v54, %v1236_v34 }
 0x52b   :  { %v1224_v1 = vadd.f32 1e-05, %v1208_v9  ;;  %v1247_v8 = vmul.f32 %v2753_v54, %v1235_v16 }
 0x52c   :  { %v1223_v57 = vadd.f32 1e-05, %v1207_v14  ;;  %v1260_v38 = vadd.f32 %v2759_v11, %v1248_v25 }
 0x52d   :  { %1636 = vrsqrt.f32 %v1224_v1  ;;  %v1259_v49 = vadd.f32 %v2759_v11, %v1247_v8 }
 0x52e   :  { %1638 = vrsqrt.f32 %v1223_v57 }
 0x52f   :  { %v1633_v45 = vpop.eup %1632  ;;  %1568 = vmatprep.mubr.msk.f32.mxu0 %vm41_vm0, %v1259_v49 }
 0x530   :  { %v1635_v39 = vpop.eup %1634  ;;  %1569 = vmatmul.mubr.msk.f32.gmra.mrb[6].mxu0 %vm41_vm0, %v1260_v38  ;;  %v1238_v33 = vmul.f32 %v1633_v45, %v1214_v17 }
 0x531   :  { %v1237_v36 = vmul.f32 %v1635_v39, %v1213_v18 }
 0x532   :  { %v1250_v19 = vmul.f32 %v2753_v54, %v1238_v33 }
 0x533   :  { %v1249_v24 = vmul.f32 %v2753_v54, %v1237_v36 }
 0x534   :  { %v1262_v55 = vadd.f32 %v2759_v11, %v1250_v19 }
 0x535   :  { %v1261_v58 = vadd.f32 %v2759_v11, %v1249_v24 }
 0x537   :  { %v1637_v15 = vpop.eup %1636  ;;  %1571 = vmatprep.mubr.msk.f32.mxu0 %vm41_vm0, %v1261_v58 }
 0x538   :  { %v1639_v2 = vpop.eup %1638  ;;  %1572 = vmatmul.mubr.msk.f32.gmra.mrb[8].mxu0 %vm41_vm0, %v1262_v55  ;;  %v1240_v29 = vmul.f32 %v1637_v15, %v1216_v62 }
 0x539   :  { %v1239_v35 = vmul.f32 %v1639_v2, %v1215_v31 }
 0x53a   :  { %v1252_v37 = vmul.f32 %v2753_v54, %v1240_v29 }
 0x53b   :  { %v1251_v10 = vmul.f32 %v2753_v54, %v1239_v35 }
 0x53c   :  { %v1264_v0 = vadd.f32 %v2759_v11, %v1252_v37 }
 0x53d   :  { %v1263_v59 = vadd.f32 %v2759_v11, %v1251_v10 }
 0x53f   :  { %1574 = vmatprep.mubr.msk.f32.mxu0 %vm41_vm0, %v1263_v59 }
 0x540   :  { %1575 = vmatmul.mubr.msk.f32.gmra.mrb[10].mxu0 %vm41_vm0, %v1264_v0 }
 0x5ea   :  { %v1567_v56 = vpop.f32.mrb[4].mxu0 }
 0x5eb   :  { %v1369_v42 = vadd.f32 %v1567_v56, %v1472_v22  ;;  %v1363_v60 = vpop.f32.mrb[5].mxu0 }
 0x5ec   :  { %v1364_v47 = vadd.f32 %v1472_v22, %v1363_v60 }
 0x5ed   :  { %1404 = vst.msk [vmem:[%s2832_s7 + $0x8] sm:$0xff] %vm1402_vm8, %v1369_v42 }
 0x5ee   :  { %1403 = vst.msk [vmem:[%s2832_s7] sm:$0xff] %vm1402_vm8, %v1364_v47 }
 0x603   :  { %v1570_v54 = vpop.f32.mrb[6].mxu0 }
 0x604   :  { %v1379_v11 = vadd.f32 %v1570_v54, %v1472_v22  ;;  %v1373_v27 = vpop.f32.mrb[7].mxu0 }
 0x605   :  { %v1374_v3 = vadd.f32 %v1472_v22, %v1373_v27 }
 0x606   :  { %1406 = vst.msk [vmem:[%s2832_s7 + $0x18] sm:$0xff] %vm1402_vm8, %v1379_v11 }
 0x607   :  { %1405 = vst.msk [vmem:[%s2832_s7 + $0x10] sm:$0xff] %vm1402_vm8, %v1374_v3 }
 0x60b   :  { %v1573_v43 = vpop.f32.mrb[8].mxu0 }
 0x60c   :  { %v1389_v20 = vadd.f32 %v1573_v43, %v1472_v22  ;;  %v1383_v32 = vpop.f32.mrb[9].mxu0 }
 0x60d   :  { %v1384_v51 = vadd.f32 %v1472_v22, %v1383_v32 }
 0x60e   :  { %1408 = vst.msk [vmem:[%s2832_s7 + $0x28] sm:$0xff] %vm1402_vm8, %v1389_v20 }
 0x60f   :  { %1407 = vst.msk [vmem:[%s2832_s7 + $0x20] sm:$0xff] %vm1402_vm8, %v1384_v51 }
 0x613   :  { %v1576_v26 = vpop.f32.mrb[10].mxu0 }
 0x614   :  { %v1399_v41 = vadd.f32 %v1576_v26, %v1472_v22  ;;  %v1393_v48 = vpop.f32.mrb[11].mxu0 }
 0x615   :  { %v1394_v7 = vadd.f32 %v1472_v22, %v1393_v48 }
 0x616   :  { %1410 = vst.msk [vmem:[%s2832_s7 + $0x38] sm:$0xff] %vm1402_vm8, %v1399_v41 }
 0x617   :  { %1409 = vst.msk [vmem:[%s2832_s7 + $0x30] sm:$0xff] %vm1402_vm8, %v1394_v7 }

</bundles_post_ra>
